<compile_context>
chip_gen: v7x
topology: tpu7x:2x2x1
jax: 0.10.0
libtpu: 0.0.40
codegen_flags: <defaults>
</compile_context>

<pallas_src>
import functools

import jax
import jax.numpy as jnp
from jax.experimental import pallas as pl
from jax.experimental.pallas import tpu as pltpu

LANE = 128
_VMEM_LIMIT = 32 * 1024 * 1024  # explicit, safe on v5e/v6e (128 MiB) and v7x (64 MiB)


def _round_up(x, m):
    return (x + m - 1) // m * m


def _pad2d(a, rows, cols):
    r, c = a.shape
    return jnp.pad(a, ((0, rows - r), (0, cols - c)))


# ----------------------------------------------------------------------------
# Kernel 1: one GCNConv layer   out = relu((A_hat @ H) @ W + b)
# ----------------------------------------------------------------------------
def _gcn_layer_kernel(a_ref, h_ref, w_ref, b_ref, o_ref, acc_ref):
    k = pl.program_id(1)

    @pl.when(k == 0)
    def _():
        acc_ref[...] = jnp.zeros_like(acc_ref)

    # bf16 x bf16 -> f32 accumulation on the MXU; contraction over node blocks.
    acc_ref[...] += jnp.dot(a_ref[...], h_ref[...],
                            preferred_element_type=jnp.float32)

    @pl.when(k == pl.num_programs(1) - 1)
    def _():
        out = jnp.dot(acc_ref[...], w_ref[...],
                      preferred_element_type=jnp.float32) + b_ref[...]
        o_ref[...] = jnp.maximum(out, 0.0).astype(o_ref.dtype)


def _gcn_layer(a_bf16, h_bf16, w, b, *, block_n):
    n_pad = a_bf16.shape[0]
    f_in = h_bf16.shape[1]
    f_out = w.shape[1]
    grid = (n_pad // block_n, n_pad // block_n)
    return pl.pallas_call(
        _gcn_layer_kernel,
        out_shape=jax.ShapeDtypeStruct((n_pad, f_out), jnp.bfloat16),
        grid_spec=pltpu.PrefetchScalarGridSpec(
            num_scalar_prefetch=0,
            grid=grid,
            in_specs=[
                pl.BlockSpec((block_n, block_n), lambda i, k: (i, k)),   # A
                pl.BlockSpec((block_n, f_in), lambda i, k: (k, 0)),      # H
                pl.BlockSpec((f_in, f_out), lambda i, k: (0, 0)),        # W
                pl.BlockSpec((1, f_out), lambda i, k: (0, 0)),           # b
            ],
            out_specs=pl.BlockSpec((block_n, f_out), lambda i, k: (i, 0)),
            scratch_shapes=[pltpu.VMEM((block_n, f_in), jnp.float32)],
        ),
        compiler_params=pltpu.CompilerParams(
            dimension_semantics=("parallel", "arbitrary"),
            vmem_limit_bytes=_VMEM_LIMIT,
        ),
    )(a_bf16, h_bf16, w, b)


# ----------------------------------------------------------------------------
# Kernel 2: BatchNorm (train-mode batch stats) + global_mean_pool + MLP +
#           softmax readout, single streaming pass over node blocks.
# ----------------------------------------------------------------------------
def _readout_kernel(h_ref, p_ref, gamma_ref, beta_ref,
                    wm1_ref, bm1_ref, wm2_ref, bm2_ref,
                    pred_ref, readout_ref,
                    sum_ref, sq_ref, ph_ref,
                    *, n_real, n_classes, block_n, eps):
    n = pl.program_id(0)

    @pl.when(n == 0)
    def _():
        sum_ref[...] = jnp.zeros_like(sum_ref)
        sq_ref[...] = jnp.zeros_like(sq_ref)
        ph_ref[...] = jnp.zeros_like(ph_ref)

    h = h_ref[...].astype(jnp.float32)
    # Mask padded node rows (they hold relu(bias) garbage from the padded A).
    row = n * block_n + jax.lax.broadcasted_iota(jnp.int32, h.shape, 0)
    h = jnp.where(row < n_real, h, 0.0)

    sum_ref[...] += jnp.sum(h, axis=0, keepdims=True)
    sq_ref[...] += jnp.sum(h * h, axis=0, keepdims=True)
    ph_ref[...] += jnp.dot(p_ref[...], h, preferred_element_type=jnp.float32)

    @pl.when(n == pl.num_programs(0) - 1)
    def _():
        inv_n = 1.0 / jnp.float32(n_real)
        mean = sum_ref[...] * inv_n
        var = sq_ref[...] * inv_n - mean * mean
        s = gamma_ref[...] * jax.lax.rsqrt(var + eps)
        # P @ BatchNorm(H)  ==  (P @ H) * s - mean * s + beta  (rowsum(P) == 1)
        g = ph_ref[...] * s - mean * s + beta_ref[...]
        # MLP: Lin(hidden3, 64) -> Lin(64, classes), no activation in between.
        g = jnp.dot(g, wm1_ref[...], preferred_element_type=jnp.float32) + bm1_ref[...]
        pred = jnp.dot(g, wm2_ref[...], preferred_element_type=jnp.float32) + bm2_ref[...]
        pred_ref[...] = pred
        # softmax(dim=1) over the real class columns only.
        col = jax.lax.broadcasted_iota(jnp.int32, pred.shape, 1)
        masked = jnp.where(col < n_classes, pred, -1e30)
        m = jnp.max(masked, axis=1, keepdims=True)
        e = jnp.exp(masked - m)
        readout_ref[...] = e / jnp.sum(e, axis=1, keepdims=True)


def _pooled_readout(h_bf16, pool_pad, pp, *, n_real, n_classes, block_n,
                    eps=1e-5):
    n_pad, f3 = h_bf16.shape
    g_pad = pool_pad.shape[0]
    m_hid = pp["wm1"].shape[1]
    c_pad = pp["wm2"].shape[1]
    kernel = functools.partial(_readout_kernel, n_real=n_real,
                               n_classes=n_classes, block_n=block_n, eps=eps)
    return pl.pallas_call(
        kernel,
        out_shape=(jax.ShapeDtypeStruct((g_pad, c_pad), jnp.float32),
                   jax.ShapeDtypeStruct((g_pad, c_pad), jnp.float32)),
        grid_spec=pltpu.PrefetchScalarGridSpec(
            num_scalar_prefetch=0,
            grid=(n_pad // block_n,),
            in_specs=[
                pl.BlockSpec((block_n, f3), lambda n: (n, 0)),     # H (nodes)
                pl.BlockSpec((g_pad, block_n), lambda n: (0, n)),  # pool P
                pl.BlockSpec((1, f3), lambda n: (0, 0)),           # gamma
                pl.BlockSpec((1, f3), lambda n: (0, 0)),           # beta
                pl.BlockSpec((f3, m_hid), lambda n: (0, 0)),       # wm1
                pl.BlockSpec((1, m_hid), lambda n: (0, 0)),        # bm1
                pl.BlockSpec((m_hid, c_pad), lambda n: (0, 0)),    # wm2
                pl.BlockSpec((1, c_pad), lambda n: (0, 0)),        # bm2
            ],
            out_specs=(pl.BlockSpec((g_pad, c_pad), lambda n: (0, 0)),
                       pl.BlockSpec((g_pad, c_pad), lambda n: (0, 0))),
            scratch_shapes=[pltpu.VMEM((1, f3), jnp.float32),
                            pltpu.VMEM((1, f3), jnp.float32),
                            pltpu.VMEM((g_pad, f3), jnp.float32)],
        ),
        compiler_params=pltpu.CompilerParams(
            dimension_semantics=("arbitrary",),
            vmem_limit_bytes=_VMEM_LIMIT,
        ),
    )(h_bf16, pool_pad, pp["gamma"], pp["beta"],
      pp["wm1"], pp["bm1"], pp["wm2"], pp["bm2"])


# ----------------------------------------------------------------------------
# Plain-JAX glue: normalized adjacency (gcn_norm + self loops) and mean-pool P.
# ----------------------------------------------------------------------------
def build_norm_adj(edge_index, edge_weight, num_nodes):
    row, col = edge_index[0], edge_index[1]
    w = edge_weight.reshape(-1).astype(jnp.float32)
    loop = jnp.arange(num_nodes, dtype=row.dtype)
    row = jnp.concatenate([row, loop])
    col = jnp.concatenate([col, loop])
    w = jnp.concatenate([w, jnp.ones((num_nodes,), jnp.float32)])
    deg = jnp.zeros((num_nodes,), jnp.float32).at[col].add(w)
    dis = jnp.where(deg > 0, 1.0 / jnp.sqrt(deg), 0.0)
    norm = dis[row] * w * dis[col]
    # out[target] += norm * x[source]  ->  A_hat[col, row] += norm
    return jnp.zeros((num_nodes, num_nodes), jnp.float32).at[(col, row)].add(norm)


def build_pool_matrix(batch, num_graphs, num_nodes):
    onehot = (jnp.arange(num_graphs)[:, None] == batch[None, :]).astype(jnp.float32)
    counts = jnp.maximum(onehot.sum(axis=1, keepdims=True), 1.0)
    return onehot / counts


# ----------------------------------------------------------------------------
# Full forward pass.
# ----------------------------------------------------------------------------
def gcn_forward_pallas(x, edge_index, edge_attr, batch, params, *,
                       num_graphs, block_n=256):
    num_nodes, channel = x.shape
    classes = params["wm2"].shape[1]

    block_n = max(LANE, min(block_n, _round_up(num_nodes, LANE)))
    n_pad = _round_up(num_nodes, block_n)
    g_pad = _round_up(num_graphs, 8)

    def pad_w(w):
        return _pad2d(w.astype(jnp.float32),
                      _round_up(w.shape[0], LANE), _round_up(w.shape[1], LANE))

    def pad_b(b):
        return _pad2d(b.astype(jnp.float32), 1, _round_up(b.shape[1], LANE))

    pp = {
        "w1": pad_w(params["w1"]), "b1": pad_b(params["b1"]),
        "w2": pad_w(params["w2"]), "b2": pad_b(params["b2"]),
        "w3": pad_w(params["w3"]), "b3": pad_b(params["b3"]),
        "gamma": pad_b(params["gamma"]), "beta": pad_b(params["beta"]),
        "wm1": pad_w(params["wm1"]), "bm1": pad_b(params["bm1"]),
        "wm2": pad_w(params["wm2"]), "bm2": pad_b(params["bm2"]),
    }

    a_hat = build_norm_adj(edge_index, edge_attr, num_nodes)
    a_pad = _pad2d(a_hat, n_pad, n_pad).astype(jnp.bfloat16)   # bf16 A_hat
    pool = build_pool_matrix(batch, num_graphs, num_nodes)
    pool_pad = _pad2d(pool, g_pad, n_pad)

    h = _pad2d(x.astype(jnp.float32), n_pad,
               _round_up(channel, LANE)).astype(jnp.bfloat16)

    h = _gcn_layer(a_pad, h, pp["w1"], pp["b1"], block_n=block_n)
    h = _gcn_layer(a_pad, h, pp["w2"], pp["b2"], block_n=block_n)
    h = _gcn_layer(a_pad, h, pp["w3"], pp["b3"], block_n=block_n)

    pred_pad, readout_pad = _pooled_readout(
        h, pool_pad, pp, n_real=num_nodes, n_classes=classes, block_n=block_n)

    return pred_pad[:num_graphs, :classes], readout_pad[:num_graphs, :classes]


# ----------------------------------------------------------------------------
# Pure-JAX reference (f32, unpadded) for a correctness sanity check.
# ----------------------------------------------------------------------------
def gcn_forward_ref(x, edge_index, edge_attr, batch, p, num_graphs):
    a_hat = build_norm_adj(edge_index, edge_attr, x.shape[0])
    pool = build_pool_matrix(batch, num_graphs, x.shape[0])
    h = jnp.maximum(a_hat @ (x @ p["w1"]) + p["b1"], 0.0)
    h = jnp.maximum(a_hat @ (h @ p["w2"]) + p["b2"], 0.0)
    h = jnp.maximum(a_hat @ (h @ p["w3"]) + p["b3"], 0.0)
    mean = jnp.mean(h, axis=0, keepdims=True)
    var = jnp.mean((h - mean) ** 2, axis=0, keepdims=True)
    h = (h - mean) / jnp.sqrt(var + 1e-5) * p["gamma"] + p["beta"]
    g = pool @ h
    g = g @ p["wm1"] + p["bm1"]
    pred = g @ p["wm2"] + p["bm2"]
    return pred, jax.nn.softmax(pred, axis=1)


if __name__ == "__main__":
    num_nodes = 256
    num_edges = 1024
    channel, hidden1, hidden2, hidden3, classes = 8, 16, 32, 16, 4
    num_graphs = 2

    key = jax.random.PRNGKey(0)
    ks = jax.random.split(key, 16)

    x = jax.random.normal(ks[0], (num_nodes, channel), jnp.float32)
    edge_index = jax.random.randint(ks[1], (2, num_edges), 0, num_nodes, jnp.int32)
    edge_attr = jax.random.uniform(ks[2], (num_edges, 1), jnp.float32, 0.1, 1.0)
    batch = jnp.sort(jax.random.randint(ks[3], (num_nodes,), 0, num_graphs, jnp.int32))

    def winit(k, shape, scale=0.1):
        return scale * jax.random.normal(k, shape, jnp.float32)

    params = {
        "w1": winit(ks[4], (channel, hidden1)),
        "b1": winit(ks[5], (1, hidden1)),
        "w2": winit(ks[6], (hidden1, hidden2)),
        "b2": winit(ks[7], (1, hidden2)),
        "w3": winit(ks[8], (hidden2, hidden3)),
        "b3": winit(ks[9], (1, hidden3)),
        "gamma": jnp.ones((1, hidden3), jnp.float32),
        "beta": jnp.zeros((1, hidden3), jnp.float32),
        "wm1": winit(ks[10], (hidden3, 64)),
        "bm1": winit(ks[11], (1, 64)),
        "wm2": winit(ks[12], (64, classes)),
        "bm2": winit(ks[13], (1, classes)),
    }

    fwd = jax.jit(functools.partial(gcn_forward_pallas,
                                    num_graphs=num_graphs, block_n=128))
    pred, probs = jax.block_until_ready(fwd(x, edge_index, edge_attr, batch, params))

    pred_ref, probs_ref = gcn_forward_ref(x, edge_index, edge_attr, batch,
                                          params, num_graphs)

    assert pred.shape == (num_graphs, classes)
    assert probs.shape == (num_graphs, classes)
    assert jnp.allclose(pred, pred_ref, atol=3e-2, rtol=3e-2)
    assert jnp.allclose(probs, probs_ref, atol=2e-2, rtol=2e-2)
    assert jnp.allclose(probs.sum(axis=1), 1.0, atol=1e-3)

    print("KERNEL_OK")
</pallas_src>

<mosaic_0001>
module attributes {stable_mosaic.version = 11 : i64} {
  func.func private @main(%arg0: i32) attributes {dimension_semantics = [#tpu.dimension_semantics<core_parallel>], iteration_bounds = array<i64: 2>, tpu.core_type = #tpu.core_type<sc_scalar_subcore>, window_params = []} {
    return
  }
}

module attributes {stable_mosaic.version = 11 : i64} {
  func.func private @main(%arg0: i32) attributes {dimension_semantics = [#tpu.dimension_semantics<core_parallel>], iteration_bounds = array<i64: 2>, tpu.core_type = #tpu.core_type<sc_scalar_subcore>, window_params = []} {
    return
  }
}

module attributes {stable_mosaic.version = 11 : i64} {
  func.func @_gcn_layer_kernel(%arg0: i32, %arg1: i32, %arg2: memref<128x128xbf16, #tpu.memory_space<vmem>>, %arg3: memref<128x128xbf16, #tpu.memory_space<vmem>>, %arg4: memref<128x128xf32, #tpu.memory_space<vmem>>, %arg5: memref<1x128xf32, #tpu.memory_space<vmem>>, %arg6: memref<128x128xbf16, #tpu.memory_space<vmem>>, %arg7: memref<128x128xf32, #tpu.memory_space<vmem>>) attributes {dimension_semantics = [#tpu.dimension_semantics<parallel>, #tpu.dimension_semantics<arbitrary>], iteration_bounds = array<i64: 2, 2>, scalar_prefetch = 0 : i64, scratch_operands = 1 : i64, tpu.core_type = #tpu.core_type<tc>, window_params = [{transform_indices = @transform_0, window_bounds = array<i64: 128, 128>}, {transform_indices = @transform_1, window_bounds = array<i64: 128, 128>}, {pipeline_mode = #tpu.pipeline_mode<synchronous>, transform_indices = @transform_2, window_bounds = array<i64: 128, 128>}, {pipeline_mode = #tpu.pipeline_mode<synchronous>, transform_indices = @transform_3, window_bounds = array<i64: 1, 128>}, {transform_indices = @transform_4, window_bounds = array<i64: 128, 128>}]} {
    %c0_i32 = arith.constant 0 : i32
    %0 = arith.cmpi eq, %arg1, %c0_i32 : i32
    %1 = arith.extui %0 : i1 to i32
    %c0_i32_0 = arith.constant 0 : i32
    %2 = arith.cmpi ne, %1, %c0_i32_0 : i32
    scf.if %2 {
      %cst_9 = arith.constant 0.000000e+00 : f32
      %12 = vector.broadcast %cst_9 : f32 to vector<128x128xf32>
      %c0_10 = arith.constant 0 : index
      %c0_11 = arith.constant 0 : index
      %13 = vector.load %arg7[%c0_10, %c0_11] : memref<128x128xf32, #tpu.memory_space<vmem>>, vector<128x128xf32>
      tpu.vector_store %arg7[%c0_10, %c0_11], %12 {strides = array<i32>} : memref<128x128xf32, #tpu.memory_space<vmem>>, vector<128x128xf32>,
    } else {
    }
    %c0 = arith.constant 0 : index
    %c0_1 = arith.constant 0 : index
    %3 = vector.load %arg7[%c0, %c0_1] : memref<128x128xf32, #tpu.memory_space<vmem>>, vector<128x128xf32>
    %c0_2 = arith.constant 0 : index
    %c0_3 = arith.constant 0 : index
    %4 = vector.load %arg2[%c0_2, %c0_3] : memref<128x128xbf16, #tpu.memory_space<vmem>>, vector<128x128xbf16>
    %c0_4 = arith.constant 0 : index
    %c0_5 = arith.constant 0 : index
    %5 = vector.load %arg3[%c0_4, %c0_5] : memref<128x128xbf16, #tpu.memory_space<vmem>>, vector<128x128xbf16>
    %cst = arith.constant dense<0.000000e+00> : vector<128x128xf32>
    %6 = tpu.matmul %4, %5, %cst {dimension_numbers = #tpu.dot_dimension_numbers<[1], [0], [0], [1], [0, 0, 1, 1], [], []>} : vector<128x128xbf16>, vector<128x128xbf16>, vector<128x128xf32> -> vector<128x128xf32>
    %7 = arith.addf %3, %6 : vector<128x128xf32>
    %c0_6 = arith.constant 0 : index
    %c0_7 = arith.constant 0 : index
    %8 = vector.load %arg7[%c0_6, %c0_7] : memref<128x128xf32, #tpu.memory_space<vmem>>, vector<128x128xf32>
    tpu.vector_store %arg7[%c0_6, %c0_7], %7 {strides = array<i32>} : memref<128x128xf32, #tpu.memory_space<vmem>>, vector<128x128xf32>,
    %c1_i32 = arith.constant 1 : i32
    %9 = arith.cmpi eq, %arg1, %c1_i32 : i32
    %10 = arith.extui %9 : i1 to i32
    %c0_i32_8 = arith.constant 0 : i32
    %11 = arith.cmpi ne, %10, %c0_i32_8 : i32
    scf.if %11 {
      %c0_9 = arith.constant 0 : index
      %c0_10 = arith.constant 0 : index
      %12 = vector.load %arg7[%c0_9, %c0_10] : memref<128x128xf32, #tpu.memory_space<vmem>>, vector<128x128xf32>
      %c0_11 = arith.constant 0 : index
      %c0_12 = arith.constant 0 : index
      %13 = vector.load %arg4[%c0_11, %c0_12] : memref<128x128xf32, #tpu.memory_space<vmem>>, vector<128x128xf32>
      %cst_13 = arith.constant dense<0.000000e+00> : vector<128x128xf32>
      %14 = tpu.matmul %12, %13, %cst_13 {dimension_numbers = #tpu.dot_dimension_numbers<[1], [0], [0], [1], [0, 0, 1, 1], [], []>} : vector<128x128xf32>, vector<128x128xf32>, vector<128x128xf32> -> vector<128x128xf32>
      %c0_14 = arith.constant 0 : index
      %c0_15 = arith.constant 0 : index
      %15 = vector.load %arg5[%c0_14, %c0_15] : memref<1x128xf32, #tpu.memory_space<vmem>>, vector<1x128xf32>
      %16 = vector.broadcast %15 : vector<1x128xf32> to vector<128x128xf32>
      %17 = arith.addf %14, %16 : vector<128x128xf32>
      %cst_16 = arith.constant 0.000000e+00 : f32
      %18 = vector.broadcast %cst_16 : f32 to vector<128x128xf32>
      %19 = arith.maximumf %17, %18 : vector<128x128xf32>
      %20 = arith.truncf %19 : vector<128x128xf32> to vector<128x128xbf16>
      %c0_17 = arith.constant 0 : index
      %c0_18 = arith.constant 0 : index
      %21 = vector.load %arg6[%c0_17, %c0_18] : memref<128x128xbf16, #tpu.memory_space<vmem>>, vector<128x128xbf16>
      tpu.vector_store %arg6[%c0_17, %c0_18], %20 {strides = array<i32>} : memref<128x128xbf16, #tpu.memory_space<vmem>>, vector<128x128xbf16>,
    } else {
    }
    return
  }
  func.func @transform_0(%arg0: i32, %arg1: i32) -> (i32, i32) {
    %c0_i32 = arith.constant 0 : i32
    return %arg0, %arg1 : i32, i32
  }
  func.func @transform_1(%arg0: i32, %arg1: i32) -> (i32, i32) {
    %c0_i32 = arith.constant 0 : i32
    %c0_i32_0 = arith.constant 0 : i32
    return %arg1, %c0_i32 : i32, i32
  }
  func.func @transform_2(%arg0: i32, %arg1: i32) -> (i32, i32) {
    %c0_i32 = arith.constant 0 : i32
    %c0_i32_0 = arith.constant 0 : i32
    %c0_i32_1 = arith.constant 0 : i32
    return %c0_i32, %c0_i32_0 : i32, i32
  }
  func.func @transform_3(%arg0: i32, %arg1: i32) -> (i32, i32) {
    %c0_i32 = arith.constant 0 : i32
    %c0_i32_0 = arith.constant 0 : i32
    %c0_i32_1 = arith.constant 0 : i32
    return %c0_i32, %c0_i32_0 : i32, i32
  }
  func.func @transform_4(%arg0: i32, %arg1: i32) -> (i32, i32) {
    %c0_i32 = arith.constant 0 : i32
    %c0_i32_0 = arith.constant 0 : i32
    return %arg0, %c0_i32 : i32, i32
  }
}

module attributes {stable_mosaic.version = 11 : i64} {
  func.func @_readout_kernel(%arg0: i32, %arg1: memref<128x128xbf16, #tpu.memory_space<vmem>>, %arg2: memref<8x128xf32, #tpu.memory_space<vmem>>, %arg3: memref<1x128xf32, #tpu.memory_space<vmem>>, %arg4: memref<1x128xf32, #tpu.memory_space<vmem>>, %arg5: memref<128x128xf32, #tpu.memory_space<vmem>>, %arg6: memref<1x128xf32, #tpu.memory_space<vmem>>, %arg7: memref<128x128xf32, #tpu.memory_space<vmem>>, %arg8: memref<1x128xf32, #tpu.memory_space<vmem>>, %arg9: memref<8x128xf32, #tpu.memory_space<vmem>>, %arg10: memref<8x128xf32, #tpu.memory_space<vmem>>, %arg11: memref<1x128xf32, #tpu.memory_space<vmem>>, %arg12: memref<1x128xf32, #tpu.memory_space<vmem>>, %arg13: memref<8x128xf32, #tpu.memory_space<vmem>>) attributes {dimension_semantics = [#tpu.dimension_semantics<arbitrary>], iteration_bounds = array<i64: 2>, scalar_prefetch = 0 : i64, scratch_operands = 3 : i64, tpu.core_type = #tpu.core_type<tc>, window_params = [{transform_indices = @transform_0, window_bounds = array<i64: 128, 128>}, {transform_indices = @transform_1, window_bounds = array<i64: 8, 128>}, {pipeline_mode = #tpu.pipeline_mode<synchronous>, transform_indices = @transform_2, window_bounds = array<i64: 1, 128>}, {pipeline_mode = #tpu.pipeline_mode<synchronous>, transform_indices = @transform_3, window_bounds = array<i64: 1, 128>}, {pipeline_mode = #tpu.pipeline_mode<synchronous>, transform_indices = @transform_4, window_bounds = array<i64: 128, 128>}, {pipeline_mode = #tpu.pipeline_mode<synchronous>, transform_indices = @transform_5, window_bounds = array<i64: 1, 128>}, {pipeline_mode = #tpu.pipeline_mode<synchronous>, transform_indices = @transform_6, window_bounds = array<i64: 128, 128>}, {pipeline_mode = #tpu.pipeline_mode<synchronous>, transform_indices = @transform_7, window_bounds = array<i64: 1, 128>}, {pipeline_mode = #tpu.pipeline_mode<synchronous>, transform_indices = @transform_8, window_bounds = array<i64: 8, 128>}, {pipeline_mode = #tpu.pipeline_mode<synchronous>, transform_indices = @transform_9, window_bounds = array<i64: 8, 128>}]} {
    %c0_i32 = arith.constant 0 : i32
    %0 = arith.cmpi eq, %arg0, %c0_i32 : i32
    %1 = arith.extui %0 : i1 to i32
    %c0_i32_0 = arith.constant 0 : i32
    %2 = arith.cmpi ne, %1, %c0_i32_0 : i32
    scf.if %2 {
      %cst_20 = arith.constant 0.000000e+00 : f32
      %32 = vector.broadcast %cst_20 : f32 to vector<1x128xf32>
      %c0_21 = arith.constant 0 : index
      %c0_22 = arith.constant 0 : index
      %33 = vector.load %arg11[%c0_21, %c0_22] : memref<1x128xf32, #tpu.memory_space<vmem>>, vector<1x128xf32>
      tpu.vector_store %arg11[%c0_21, %c0_22], %32 {strides = array<i32>} : memref<1x128xf32, #tpu.memory_space<vmem>>, vector<1x128xf32>,
      %cst_23 = arith.constant 0.000000e+00 : f32
      %34 = vector.broadcast %cst_23 : f32 to vector<1x128xf32>
      %c0_24 = arith.constant 0 : index
      %c0_25 = arith.constant 0 : index
      %35 = vector.load %arg12[%c0_24, %c0_25] : memref<1x128xf32, #tpu.memory_space<vmem>>, vector<1x128xf32>
      tpu.vector_store %arg12[%c0_24, %c0_25], %34 {strides = array<i32>} : memref<1x128xf32, #tpu.memory_space<vmem>>, vector<1x128xf32>,
      %cst_26 = arith.constant 0.000000e+00 : f32
      %36 = vector.broadcast %cst_26 : f32 to vector<8x128xf32>
      %c0_27 = arith.constant 0 : index
      %c0_28 = arith.constant 0 : index
      %37 = vector.load %arg13[%c0_27, %c0_28] : memref<8x128xf32, #tpu.memory_space<vmem>>, vector<8x128xf32>
      tpu.vector_store %arg13[%c0_27, %c0_28], %36 {strides = array<i32>} : memref<8x128xf32, #tpu.memory_space<vmem>>, vector<8x128xf32>,
    } else {
    }
    %c0 = arith.constant 0 : index
    %c0_1 = arith.constant 0 : index
    %3 = vector.load %arg1[%c0, %c0_1] : memref<128x128xbf16, #tpu.memory_space<vmem>>, vector<128x128xbf16>
    %4 = arith.extf %3 : vector<128x128xbf16> to vector<128x128xf32>
    %c128_i32 = arith.constant 128 : i32
    %5 = arith.muli %arg0, %c128_i32 : i32
    %6 = tpu.iota {dimensions = array<i32: 0>} : vector<128x128xi32>
    %7 = vector.broadcast %5 : i32 to vector<128x128xi32>
    %8 = arith.addi %7, %6 : vector<128x128xi32>
    %c256_i32 = arith.constant 256 : i32
    %9 = vector.broadcast %c256_i32 : i32 to vector<128x128xi32>
    %10 = arith.cmpi slt, %8, %9 : vector<128x128xi32>
    %cst = arith.constant 0.000000e+00 : f32
    %11 = vector.broadcast %cst : f32 to vector<128x128xf32>
    %12 = arith.select %10, %4, %11 : vector<128x128xi1>, vector<128x128xf32>
    %c0_2 = arith.constant 0 : index
    %c0_3 = arith.constant 0 : index
    %13 = vector.load %arg11[%c0_2, %c0_3] : memref<1x128xf32, #tpu.memory_space<vmem>>, vector<1x128xf32>
    %cst_4 = arith.constant dense<0.000000e+00> : vector<128xf32>
    %14 = vector.multi_reduction <add>, %12, %cst_4 [0] : vector<128x128xf32> to vector<128xf32>
    %15 = vector.shape_cast %14 : vector<128xf32> to vector<1x128xf32>
    %16 = arith.addf %13, %15 : vector<1x128xf32>
    %c0_5 = arith.constant 0 : index
    %c0_6 = arith.constant 0 : index
    %17 = vector.load %arg11[%c0_5, %c0_6] : memref<1x128xf32, #tpu.memory_space<vmem>>, vector<1x128xf32>
    tpu.vector_store %arg11[%c0_5, %c0_6], %16 {strides = array<i32>} : memref<1x128xf32, #tpu.memory_space<vmem>>, vector<1x128xf32>,
    %c0_7 = arith.constant 0 : index
    %c0_8 = arith.constant 0 : index
    %18 = vector.load %arg12[%c0_7, %c0_8] : memref<1x128xf32, #tpu.memory_space<vmem>>, vector<1x128xf32>
    %19 = arith.mulf %12, %12 : vector<128x128xf32>
    %cst_9 = arith.constant dense<0.000000e+00> : vector<128xf32>
    %20 = vector.multi_reduction <add>, %19, %cst_9 [0] : vector<128x128xf32> to vector<128xf32>
    %21 = vector.shape_cast %20 : vector<128xf32> to vector<1x128xf32>
    %22 = arith.addf %18, %21 : vector<1x128xf32>
    %c0_10 = arith.constant 0 : index
    %c0_11 = arith.constant 0 : index
    %23 = vector.load %arg12[%c0_10, %c0_11] : memref<1x128xf32, #tpu.memory_space<vmem>>, vector<1x128xf32>
    tpu.vector_store %arg12[%c0_10, %c0_11], %22 {strides = array<i32>} : memref<1x128xf32, #tpu.memory_space<vmem>>, vector<1x128xf32>,
    %c0_12 = arith.constant 0 : index
    %c0_13 = arith.constant 0 : index
    %24 = vector.load %arg13[%c0_12, %c0_13] : memref<8x128xf32, #tpu.memory_space<vmem>>, vector<8x128xf32>
    %c0_14 = arith.constant 0 : index
    %c0_15 = arith.constant 0 : index
    %25 = vector.load %arg2[%c0_14, %c0_15] : memref<8x128xf32, #tpu.memory_space<vmem>>, vector<8x128xf32>
    %cst_16 = arith.constant dense<0.000000e+00> : vector<8x128xf32>
    %26 = tpu.matmul %25, %12, %cst_16 {dimension_numbers = #tpu.dot_dimension_numbers<[1], [0], [0], [1], [0, 0, 1, 1], [], []>} : vector<8x128xf32>, vector<128x128xf32>, vector<8x128xf32> -> vector<8x128xf32>
    %27 = arith.addf %24, %26 : vector<8x128xf32>
    %c0_17 = arith.constant 0 : index
    %c0_18 = arith.constant 0 : index
    %28 = vector.load %arg13[%c0_17, %c0_18] : memref<8x128xf32, #tpu.memory_space<vmem>>, vector<8x128xf32>
    tpu.vector_store %arg13[%c0_17, %c0_18], %27 {strides = array<i32>} : memref<8x128xf32, #tpu.memory_space<vmem>>, vector<8x128xf32>,
    %c1_i32 = arith.constant 1 : i32
    %29 = arith.cmpi eq, %arg0, %c1_i32 : i32
    %30 = arith.extui %29 : i1 to i32
    %c0_i32_19 = arith.constant 0 : i32
    %31 = arith.cmpi ne, %30, %c0_i32_19 : i32
    scf.if %31 {
      %cst_20 = arith.constant 1.000000e+00 : f32
      %cst_21 = arith.constant 2.560000e+02 : f32
      %32 = arith.divf %cst_20, %cst_21 : f32
      %c0_22 = arith.constant 0 : index
      %c0_23 = arith.constant 0 : index
      %33 = vector.load %arg11[%c0_22, %c0_23] : memref<1x128xf32, #tpu.memory_space<vmem>>, vector<1x128xf32>
      %34 = vector.broadcast %32 : f32 to vector<1x128xf32>
      %35 = arith.mulf %33, %34 : vector<1x128xf32>
      %c0_24 = arith.constant 0 : index
      %c0_25 = arith.constant 0 : index
      %36 = vector.load %arg12[%c0_24, %c0_25] : memref<1x128xf32, #tpu.memory_space<vmem>>, vector<1x128xf32>
      %37 = vector.broadcast %32 : f32 to vector<1x128xf32>
      %38 = arith.mulf %36, %37 : vector<1x128xf32>
      %39 = arith.mulf %35, %35 : vector<1x128xf32>
      %40 = arith.subf %38, %39 : vector<1x128xf32>
      %c0_26 = arith.constant 0 : index
      %c0_27 = arith.constant 0 : index
      %41 = vector.load %arg3[%c0_26, %c0_27] : memref<1x128xf32, #tpu.memory_space<vmem>>, vector<1x128xf32>
      %cst_28 = arith.constant 9.99999974E-6 : f32
      %42 = vector.broadcast %cst_28 : f32 to vector<1x128xf32>
      %43 = arith.addf %40, %42 : vector<1x128xf32>
      %44 = math.rsqrt %43 : vector<1x128xf32>
      %45 = arith.mulf %41, %44 : vector<1x128xf32>
      %c0_29 = arith.constant 0 : index
      %c0_30 = arith.constant 0 : index
      %46 = vector.load %arg13[%c0_29, %c0_30] : memref<8x128xf32, #tpu.memory_space<vmem>>, vector<8x128xf32>
      %47 = vector.broadcast %45 : vector<1x128xf32> to vector<8x128xf32>
      %48 = arith.mulf %46, %47 : vector<8x128xf32>
      %49 = arith.mulf %35, %45 : vector<1x128xf32>
      %50 = vector.broadcast %49 : vector<1x128xf32> to vector<8x128xf32>
      %51 = arith.subf %48, %50 : vector<8x128xf32>
      %c0_31 = arith.constant 0 : index
      %c0_32 = arith.constant 0 : index
      %52 = vector.load %arg4[%c0_31, %c0_32] : memref<1x128xf32, #tpu.memory_space<vmem>>, vector<1x128xf32>
      %53 = vector.broadcast %52 : vector<1x128xf32> to vector<8x128xf32>
      %54 = arith.addf %51, %53 : vector<8x128xf32>
      %c0_33 = arith.constant 0 : index
      %c0_34 = arith.constant 0 : index
      %55 = vector.load %arg5[%c0_33, %c0_34] : memref<128x128xf32, #tpu.memory_space<vmem>>, vector<128x128xf32>
      %cst_35 = arith.constant dense<0.000000e+00> : vector<8x128xf32>
      %56 = tpu.matmul %54, %55, %cst_35 {dimension_numbers = #tpu.dot_dimension_numbers<[1], [0], [0], [1], [0, 0, 1, 1], [], []>} : vector<8x128xf32>, vector<128x128xf32>, vector<8x128xf32> -> vector<8x128xf32>
      %c0_36 = arith.constant 0 : index
      %c0_37 = arith.constant 0 : index
      %57 = vector.load %arg6[%c0_36, %c0_37] : memref<1x128xf32, #tpu.memory_space<vmem>>, vector<1x128xf32>
      %58 = vector.broadcast %57 : vector<1x128xf32> to vector<8x128xf32>
      %59 = arith.addf %56, %58 : vector<8x128xf32>
      %c0_38 = arith.constant 0 : index
      %c0_39 = arith.constant 0 : index
      %60 = vector.load %arg7[%c0_38, %c0_39] : memref<128x128xf32, #tpu.memory_space<vmem>>, vector<128x128xf32>
      %cst_40 = arith.constant dense<0.000000e+00> : vector<8x128xf32>
      %61 = tpu.matmul %59, %60, %cst_40 {dimension_numbers = #tpu.dot_dimension_numbers<[1], [0], [0], [1], [0, 0, 1, 1], [], []>} : vector<8x128xf32>, vector<128x128xf32>, vector<8x128xf32> -> vector<8x128xf32>
      %c0_41 = arith.constant 0 : index
      %c0_42 = arith.constant 0 : index
      %62 = vector.load %arg8[%c0_41, %c0_42] : memref<1x128xf32, #tpu.memory_space<vmem>>, vector<1x128xf32>
      %63 = vector.broadcast %62 : vector<1x128xf32> to vector<8x128xf32>
      %64 = arith.addf %61, %63 : vector<8x128xf32>
      %c0_43 = arith.constant 0 : index
      %c0_44 = arith.constant 0 : index
      %65 = vector.load %arg9[%c0_43, %c0_44] : memref<8x128xf32, #tpu.memory_space<vmem>>, vector<8x128xf32>
      tpu.vector_store %arg9[%c0_43, %c0_44], %64 {strides = array<i32>} : memref<8x128xf32, #tpu.memory_space<vmem>>, vector<8x128xf32>,
      %66 = tpu.iota {dimensions = array<i32: 1>} : vector<8x128xi32>
      %c4_i32 = arith.constant 4 : i32
      %67 = vector.broadcast %c4_i32 : i32 to vector<8x128xi32>
      %68 = arith.cmpi slt, %66, %67 : vector<8x128xi32>
      %cst_45 = arith.constant -1.000000e+30 : f32
      %69 = vector.broadcast %cst_45 : f32 to vector<8x128xf32>
      %70 = arith.select %68, %64, %69 : vector<8x128xi1>, vector<8x128xf32>
      %cst_46 = arith.constant dense<0xFF800000> : vector<8xf32>
      %71 = vector.multi_reduction <maximumf>, %70, %cst_46 [1] : vector<8x128xf32> to vector<8xf32>
      %72 = vector.shape_cast %71 : vector<8xf32> to vector<8x1xf32>
      %73 = vector.broadcast %72 : vector<8x1xf32> to vector<8x128xf32>
      %74 = arith.subf %70, %73 : vector<8x128xf32>
      %75 = math.exp %74 : vector<8x128xf32>
      %cst_47 = arith.constant dense<0.000000e+00> : vector<8xf32>
      %76 = vector.multi_reduction <add>, %75, %cst_47 [1] : vector<8x128xf32> to vector<8xf32>
      %77 = vector.shape_cast %76 : vector<8xf32> to vector<8x1xf32>
      %78 = vector.broadcast %77 : vector<8x1xf32> to vector<8x128xf32>
      %79 = arith.divf %75, %78 : vector<8x128xf32>
      %c0_48 = arith.constant 0 : index
      %c0_49 = arith.constant 0 : index
      %80 = vector.load %arg10[%c0_48, %c0_49] : memref<8x128xf32, #tpu.memory_space<vmem>>, vector<8x128xf32>
      tpu.vector_store %arg10[%c0_48, %c0_49], %79 {strides = array<i32>} : memref<8x128xf32, #tpu.memory_space<vmem>>, vector<8x128xf32>,
    } else {
    }
    return
  }
  func.func @transform_0(%arg0: i32) -> (i32, i32) {
    %c0_i32 = arith.constant 0 : i32
    %c0_i32_0 = arith.constant 0 : i32
    return %arg0, %c0_i32 : i32, i32
  }
  func.func @transform_1(%arg0: i32) -> (i32, i32) {
    %c0_i32 = arith.constant 0 : i32
    %c0_i32_0 = arith.constant 0 : i32
    return %c0_i32, %arg0 : i32, i32
  }
  func.func @transform_2(%arg0: i32) -> (i32, i32) {
    %c0_i32 = arith.constant 0 : i32
    %c0_i32_0 = arith.constant 0 : i32
    %c0_i32_1 = arith.constant 0 : i32
    return %c0_i32, %c0_i32_0 : i32, i32
  }
  func.func @transform_3(%arg0: i32) -> (i32, i32) {
    %c0_i32 = arith.constant 0 : i32
    %c0_i32_0 = arith.constant 0 : i32
    %c0_i32_1 = arith.constant 0 : i32
    return %c0_i32, %c0_i32_0 : i32, i32
  }
  func.func @transform_4(%arg0: i32) -> (i32, i32) {
    %c0_i32 = arith.constant 0 : i32
    %c0_i32_0 = arith.constant 0 : i32
    %c0_i32_1 = arith.constant 0 : i32
    return %c0_i32, %c0_i32_0 : i32, i32
  }
  func.func @transform_5(%arg0: i32) -> (i32, i32) {
    %c0_i32 = arith.constant 0 : i32
    %c0_i32_0 = arith.constant 0 : i32
    %c0_i32_1 = arith.constant 0 : i32
    return %c0_i32, %c0_i32_0 : i32, i32
  }
  func.func @transform_6(%arg0: i32) -> (i32, i32) {
    %c0_i32 = arith.constant 0 : i32
    %c0_i32_0 = arith.constant 0 : i32
    %c0_i32_1 = arith.constant 0 : i32
    return %c0_i32, %c0_i32_0 : i32, i32
  }
  func.func @transform_7(%arg0: i32) -> (i32, i32) {
    %c0_i32 = arith.constant 0 : i32
    %c0_i32_0 = arith.constant 0 : i32
    %c0_i32_1 = arith.constant 0 : i32
    return %c0_i32, %c0_i32_0 : i32, i32
  }
  func.func @transform_8(%arg0: i32) -> (i32, i32) {
    %c0_i32 = arith.constant 0 : i32
    %c0_i32_0 = arith.constant 0 : i32
    %c0_i32_1 = arith.constant 0 : i32
    return %c0_i32, %c0_i32_0 : i32, i32
  }
  func.func @transform_9(%arg0: i32) -> (i32, i32) {
    %c0_i32 = arith.constant 0 : i32
    %c0_i32_0 = arith.constant 0 : i32
    %c0_i32_1 = arith.constant 0 : i32
    return %c0_i32, %c0_i32_0 : i32, i32
  }
}

</mosaic_0001>

<bundles_post_ra>
// kernel: gcn_forward_pallas.4
= control target key start
LH: loop header
LB: loop body
LE: loop exit
PB: predicated region body
PF: predicated region fallthrough
CT: control target
= control target key end

     0   :  { %s1476_s15 = smov 0   ;;  %s1478_s16 = smov 0   ;;  %s1669_s0 = inlined_call_operand.vmem [shape: bf16[256,256], index: 0, kind: input, shape index: {}]   ;;  %s1670_s1 = inlined_call_operand.vmem [shape: bf16[256,128], index: 1, kind: input, shape index: {}]   ;;  %s1671_s2 = inlined_call_operand.vmem [shape: f32[128,128], index: 2, kind: input, shape index: {}]   ;;  %s1672_s3 = inlined_call_operand.vmem [shape: f32[1,128], index: 3, kind: input, shape index: {}]   ;;  %s1673_s4 = inlined_call_operand.vmem [shape: bf16[256,128], index: 4, kind: output, shape index: {}]  }
   0x1   :  { %s1480_s17 = smov 0   ;;  %s1482_s18 = smov 0  }
   0x2   :  { %s1484_s19 = smov 0   ;;  %s1486_s20 = smov 0  }
   0x3   :  { %s1488_s21 = smov 0  }
   0x4 LB: > { %s23_s22 = sadd.s32 1, %s1440_s19  ;;  %s26_s23 = sadd.s32 1, %s1444_s20  ;;  %s1448_s21 = sphi %s1488_s21, %s14_s21   ;;  %s1444_s20 = sphi %s1486_s20, %s1679_s20   ;;  %s1440_s19 = sphi %s1484_s19, %s1678_s19   ;;  %s1436_s18 = sphi %s1482_s18, %s1677_s18   ;;  %s1432_s17 = sphi %s1480_s17, %s1676_s17   ;;  %s1428_s16 = sphi %s1478_s16, %s1675_s16   ;;  %s1424_s15 = sphi %s1476_s15, %s1674_s15  }
   0x5   : > { %p24_p0 = scmp.ge.s32.totalorder %s23_s22, 2  ;;  %p42_p1 = scmp.ne.s32.totalorder %s1428_s16, %s1424_s15 }
   0x6   : > { %p43_p2 = scmp.eq.s32.totalorder %s1448_s21, 0  ;;  %s35_s27 = sadd.s32 1, %s1428_s16 }
   0x7   : > { %s1681_s22 = smov (%p24_p0, %s23_s22), 0  ;;  %s1683_s23 = smov (!%p24_p0, %s26_s23), %s1444_s20 }
   0x8   : > { %p44_p3 = por %p43_p2, %p42_p1  ;;  %p28_p4 = scmp.ge.s32.totalorder %s1683_s23, 2 }
   0x9   : > { %s31_s24 = ssub.s32 %s1440_s19, %s1681_s22  ;;  %p1009_p6 = scmp.ge.s32.totalorder %s1448_s21, 4 }
   0xa   : > { %s1685_s23 = smov (%p28_p4, %s1683_s23), 0 }
   0xb   : > { %s30_s25 = ssub.s32 %s1444_s20, %s1685_s23  ;;  %168 = sbr.rel (%p1009_p6) target bundleno = 34 (0x22), region = 24 }
   0xc   : > { %s32_s26 = sor.u32 %s31_s24, %s30_s25 }
   0xd   : > { %p33_p5 = scmp.eq.s32.totalorder %s32_s26, 0 }
   0xf   : > { %s1527_s28 = scalar_select %p33_p5, %s1428_s16, %s35_s27  }
  0x12   : > { %171 = sbr.rel (!%p44_p3) target bundleno = 34 (0x22), region = 28  ;;  %s173_s29 = sand.u32 (%p44_p3), 1, %s1428_s16  }
  0x13   : > { %s1057_s30 = sshll.u32 (%p44_p3), %s1444_s20, 5  ;;  %s1010_s5 = sshll.u32 (%p44_p3), %s173_s29, 6 }
  0x14   : > { %s178_s6 = sadd.s32 (%p44_p3), %s1440_s19, %s1057_s30  ;;  %s175_s11 = scalar_lea.vmem (%p44_p3), [#allocation3], %s1010_s5 }
  0x15   : > { %s1013_s7 = sshll.u32 (%p44_p3), %s178_s6, 2 }
  0x16   : > { %s1536_s10 = scalar_lea.vmem (%p44_p3), %s1669_s0, %s1013_s7 }
  0x17   : > { %v196_v0 = vld [vmem:[%s1536_s10] sm:$0xf] (%p44_p3)  ;;  %v198_v1 = vld [vmem:[%s1536_s10 + $0x8] sm:$0xf] (%p44_p3)  ;;  %v200_v2 = vld [vmem:[%s1536_s10 + $0x10] sm:$0xf] (%p44_p3) }
  0x18   : > { %197 = vst [vmem:[%s175_s11] sm:$0xf] (%p44_p3), %v196_v0  ;;  %199 = vst [vmem:[%s175_s11 + $0x4] sm:$0xf] (%p44_p3), %v198_v1  ;;  %v202_v3 = vld [vmem:[%s1536_s10 + $0x18] sm:$0xf] (%p44_p3) }
  0x19   : > { %201 = vst [vmem:[%s175_s11 + $0x8] sm:$0xf] %v200_v2  ;;  %v204_v4 = vld [vmem:[%s1536_s10 + $0x20] sm:$0xf]  ;;  %v206_v5 = vld [vmem:[%s1536_s10 + $0x28] sm:$0xf] }
  0x1a   : > { %203 = vst [vmem:[%s175_s11 + $0xc] sm:$0xf] %v202_v3  ;;  %205 = vst [vmem:[%s175_s11 + $0x10] sm:$0xf] %v204_v4  ;;  %v208_v6 = vld [vmem:[%s1536_s10 + $0x30] sm:$0xf] }
  0x1b   : > { %207 = vst [vmem:[%s175_s11 + $0x14] sm:$0xf] %v206_v5  ;;  %v210_v7 = vld [vmem:[%s1536_s10 + $0x38] sm:$0xf]  ;;  %v212_v8 = vld [vmem:[%s1536_s10 + $0x40] sm:$0xf] }
  0x1c   : > { %209 = vst [vmem:[%s175_s11 + $0x18] sm:$0xf] %v208_v6  ;;  %211 = vst [vmem:[%s175_s11 + $0x1c] sm:$0xf] %v210_v7  ;;  %v214_v9 = vld [vmem:[%s1536_s10 + $0x48] sm:$0xf] }
  0x1d   : > { %213 = vst [vmem:[%s175_s11 + $0x20] sm:$0xf] %v212_v8  ;;  %v216_v10 = vld [vmem:[%s1536_s10 + $0x50] sm:$0xf]  ;;  %v218_v11 = vld [vmem:[%s1536_s10 + $0x58] sm:$0xf] }
  0x1e   : > { %215 = vst [vmem:[%s175_s11 + $0x24] sm:$0xf] %v214_v9  ;;  %217 = vst [vmem:[%s175_s11 + $0x28] sm:$0xf] %v216_v10  ;;  %v220_v12 = vld [vmem:[%s1536_s10 + $0x60] sm:$0xf] }
  0x1f   : > { %219 = vst [vmem:[%s175_s11 + $0x2c] sm:$0xf] %v218_v11  ;;  %v222_v13 = vld [vmem:[%s1536_s10 + $0x68] sm:$0xf]  ;;  %v224_v14 = vld [vmem:[%s1536_s10 + $0x70] sm:$0xf] }
  0x20   : > { %221 = vst [vmem:[%s175_s11 + $0x30] sm:$0xf] %v220_v12  ;;  %223 = vst [vmem:[%s175_s11 + $0x34] sm:$0xf] %v222_v13  ;;  %v226_v15 = vld [vmem:[%s1536_s10 + $0x78] sm:$0xf] }
  0x21   : > { %225 = vst [vmem:[%s175_s11 + $0x38] sm:$0xf] %v224_v14  ;;  %227 = vst [vmem:[%s175_s11 + $0x3c] sm:$0xf] %v226_v15 }
  0x22 PF: > { %p1014_p7 = scmp.ge.s32.totalorder %s1448_s21, 1  ;;  %p290_p8 = scmp.lt.s32.totalorder %s1448_s21, 5 }
  0x24   : > { %p291_p9 = pnand %p1014_p7, %p290_p8 }
  0x25   : > { %s297_s12 = sand.u32 (!%p291_p9), 1, %s1424_s15   ;;  %s1016_s13 = sshll.u32 (!%p291_p9), %s1432_s17, 4 }
  0x26   : > { %294 = sbr.rel (%p291_p9) target bundleno = 551 (0x227), region = 73  ;;  %s1015_s14 = sshll.u32 (!%p291_p9), %s297_s12, 6 }
  0x27   : > { %p329_p10 = scmp.lt.s32.totalorder (!%p291_p9), %s1016_s13, 31  ;;  %s1018_s24 = sshll.u32 (!%p291_p9), %s1436_s18, 4 }
  0x28   : > { %p335_p11 = scmp.lt.s32.totalorder (!%p291_p9), %s1018_s24, 31  ;;  %s1569_s15 = scalar_lea.vmem (!%p291_p9), [#allocation3], %s1015_s14 }
  0x29   : > { %p1020_p12 = scmp.ne.s32.totalorder (!%p291_p9), %s1432_s17, 0 }
  0x2d   : > { %s1687_s13 = smov (!%p329_p10, %s1016_s13), 31  ;;  %s1689_s24 = smov (!%p335_p11, %s1018_s24), 31 }
  0x2e   : > { %s1017_s25 = sshll.u32 %s1687_s13, 2  ;;  %s1019_s30 = sshll.u32 %s1689_s24, 2  ;;  %v1450_v16 = vmov (!%p1020_p12), 0.0  }
  0x2f   : > { %s1562_s29 = scalar_lea.vmem %s1670_s1, %s1017_s25  ;;  %s1567_s7 = scalar_lea.vmem %s1673_s4, %s1019_s30  ;;  %345 = vst [vmem:[#allocation2] sm:$0xff] (!%p1020_p12), %v1450_v16  ;;  %346 = vst [vmem:[#allocation2 + $0x8] sm:$0xff] (!%p1020_p12), %v1450_v16 }
  0x30   : > { %344 = sbr.rel (%p1020_p12) target bundleno = 55 (0x37), region = 81  ;;  %347 = vst [vmem:[#allocation2 + $0x10] sm:$0xff] (!%p1020_p12), %v1450_v16  ;;  %348 = vst [vmem:[#allocation2 + $0x18] sm:$0xff] (!%p1020_p12), %v1450_v16 }
  0x31   : > { %349 = vst [vmem:[#allocation2 + $0x20] sm:$0xff] (!%p1020_p12), %v1450_v16  ;;  %350 = vst [vmem:[#allocation2 + $0x28] sm:$0xff] (!%p1020_p12), %v1450_v16 }
  0x32   : > { %351 = vst [vmem:[#allocation2 + $0x30] sm:$0xff] (!%p1020_p12), %v1450_v16  ;;  %352 = vst [vmem:[#allocation2 + $0x38] sm:$0xff] (!%p1020_p12), %v1450_v16 }
  0x33   : > { %353 = vst [vmem:[#allocation2 + $0x40] sm:$0xff] (!%p1020_p12), %v1450_v16  ;;  %354 = vst [vmem:[#allocation2 + $0x48] sm:$0xff] (!%p1020_p12), %v1450_v16 }
  0x34   : > { %355 = vst [vmem:[#allocation2 + $0x50] sm:$0xff] (!%p1020_p12), %v1450_v16  ;;  %356 = vst [vmem:[#allocation2 + $0x58] sm:$0xff] (!%p1020_p12), %v1450_v16 }
  0x35   : > { %357 = vst [vmem:[#allocation2 + $0x60] sm:$0xff] (!%p1020_p12), %v1450_v16  ;;  %358 = vst [vmem:[#allocation2 + $0x68] sm:$0xff] (!%p1020_p12), %v1450_v16 }
  0x36   : > { %359 = vst [vmem:[#allocation2 + $0x70] sm:$0xff] (!%p1020_p12), %v1450_v16  ;;  %360 = vst [vmem:[#allocation2 + $0x78] sm:$0xff] (!%p1020_p12), %v1450_v16 }
  0x37 PF: > { %v1378_v17 = vld [vmem:[%s1562_s29] sm:$0xff]   ;;  %v1379_v18 = vld [vmem:[%s1562_s29 + $0x8] sm:$0xff]   ;;  %v1380_v19 = vld [vmem:[%s1562_s29 + $0x10] sm:$0xff]   ;;  %p1037_p13 = scmp.ne.s32.totalorder %s1432_s17, 1 }
  0x38   : > { %1169 = vmatprep.subr.bf16.mxu0 %v1378_v17  ;;  %1289 = vmatprep.subr.bf16.mxu1 %v1378_v17  ;;  %v1381_v20 = vld [vmem:[%s1562_s29 + $0x18] sm:$0xff]   ;;  %v1386_v21 = vld [vmem:[%s1569_s15] sm:$0xff]   ;;  %v1383_v24 = vld [vmem:[%s1562_s29 + $0x28] sm:$0xff]  }
  0x39   : > { %1170 = vmatpush3.bf16.msra.mxu0 %v1378_v17  ;;  %1297 = vmatpush3.bf16.msra.mxu1 %v1378_v17  ;;  %v1387_v22 = vld [vmem:[%s1569_s15 + $0x20] sm:$0xff]   ;;  %v1384_v25 = vld [vmem:[%s1562_s29 + $0x30] sm:$0xff]   ;;  %v1385_v26 = vld [vmem:[%s1562_s29 + $0x38] sm:$0xff]  }
  0x3a   : > { %1171 = vmatprep.subr.bf16.mxu0 %v1379_v18  ;;  %1290 = vmatprep.subr.bf16.mxu1 %v1379_v18  ;;  %v1382_v23 = vld [vmem:[%s1562_s29 + $0x20] sm:$0xff]   ;;  %v1388_v27 = vld [vmem:[%s1569_s15 + $0x8] sm:$0xff]   ;;  %v1390_v29 = vld [vmem:[%s1569_s15 + $0x10] sm:$0xff]  }
  0x3b   : > { %1185 = vmatprep.mubr.bf16.mxu0 %v1386_v21  ;;  %1193 = vmatprep.mubr.bf16.mxu1 %v1387_v22  ;;  %v1389_v28 = vld [vmem:[%s1569_s15 + $0x28] sm:$0xff]   ;;  %v1391_v30 = vld [vmem:[%s1569_s15 + $0x30] sm:$0xff]   ;;  %v1392_v31 = vld [vmem:[%s1569_s15 + $0x18] sm:$0xff]  }
  0x3c   : > { %v1393_v32 = vld [vmem:[%s1569_s15 + $0x38] sm:$0xff]   ;;  %v363_v33 = vld [vmem:[#allocation2 + $0x10] sm:$0xff]  ;;  %v361_v35 = vld [vmem:[#allocation2] sm:$0xff] }
  0x3d   : > { %1172 = vmatpush3.bf16.msra.mxu0 %v1379_v18  ;;  %1298 = vmatpush3.bf16.msra.mxu1 %v1379_v18  ;;  %v371_v34 = vld [vmem:[#allocation2 + $0x50] sm:$0xff]  ;;  %v369_v36 = vld [vmem:[#allocation2 + $0x40] sm:$0xff]  ;;  %v364_v39 = vld [vmem:[#allocation2 + $0x18] sm:$0xff] }
  0x3e   : > { %1173 = vmatprep.subr.bf16.mxu0 %v1380_v19  ;;  %1291 = vmatprep.subr.bf16.mxu1 %v1380_v19  ;;  %v372_v40 = vld [vmem:[#allocation2 + $0x58] sm:$0xff]  ;;  %v362_v45 = vld [vmem:[#allocation2 + $0x8] sm:$0xff]  ;;  %v367_v57 = vld [vmem:[#allocation2 + $0x30] sm:$0xff] }
  0x3f   : > { %v370_v46 = vld [vmem:[#allocation2 + $0x48] sm:$0xff]  ;;  %v375_v58 = vld [vmem:[#allocation2 + $0x70] sm:$0xff]  ;;  %v365_v59 = vld [vmem:[#allocation2 + $0x20] sm:$0xff] }
  0x40   : > { %v373_v60 = vld [vmem:[#allocation2 + $0x60] sm:$0xff]  ;;  %v368_v63 = vld [vmem:[#allocation2 + $0x38] sm:$0xff]  ;;  %v366_v5 = vld [vmem:[#allocation2 + $0x28] sm:$0xff] }
  0x41   : > { %1174 = vmatpush3.bf16.msra.mxu0 %v1380_v19  ;;  %1299 = vmatpush3.bf16.msra.mxu1 %v1380_v19  ;;  %v376_v0 = vld [vmem:[#allocation2 + $0x78] sm:$0xff]  ;;  %v374_v6 = vld [vmem:[#allocation2 + $0x68] sm:$0xff]  ;;  %v654_v17 = vld [vmem:[%s1671_s2] sm:$0xff] (!%p1037_p13) }
  0x42   : > { %1175 = vmatprep.subr.bf16.mxu0 %v1381_v20  ;;  %1292 = vmatprep.subr.bf16.mxu1 %v1381_v20  ;;  %v655_v18 = vld [vmem:[%s1671_s2 + $0x8] sm:$0xff] (!%p1037_p13)  ;;  %v656_v19 = vld [vmem:[%s1671_s2 + $0x10] sm:$0xff] (!%p1037_p13)  ;;  %v657_v21 = vld [vmem:[%s1671_s2 + $0x18] sm:$0xff] (!%p1037_p13) }
  0x43   : > { %v1261_v22 = vpack.c.bf16 (!%p1037_p13), %v657_v21, %v656_v19 }
  0x45   : > { %1176 = vmatpush3.bf16.msra.mxu0 %v1381_v20  ;;  %1300 = vmatpush3.bf16.msra.mxu1 %v1381_v20  ;;  %v1257_v20 = vpack.c.bf16 (!%p1037_p13), %v655_v18, %v654_v17 }
  0x46   : > { %1177 = vmatprep.subr.bf16.mxu0 %v1382_v23  ;;  %1293 = vmatprep.subr.bf16.mxu1 %v1382_v23 }
  0x49   : > { %1178 = vmatpush3.bf16.msra.mxu0 %v1382_v23  ;;  %1301 = vmatpush3.bf16.msra.mxu1 %v1382_v23  ;;  %v658_v23 = vld [vmem:[%s1671_s2 + $0x20] sm:$0xff] (!%p1037_p13) }
  0x4a   : > { %1179 = vmatprep.subr.bf16.mxu0 %v1383_v24  ;;  %1294 = vmatprep.subr.bf16.mxu1 %v1383_v24 }
  0x4d   : > { %1180 = vmatpush3.bf16.msra.mxu0 %v1383_v24  ;;  %1302 = vmatpush3.bf16.msra.mxu1 %v1383_v24  ;;  %v659_v24 = vld [vmem:[%s1671_s2 + $0x28] sm:$0xff] (!%p1037_p13) }
  0x4e   : > { %1181 = vmatprep.subr.bf16.mxu0 %v1384_v25  ;;  %1295 = vmatprep.subr.bf16.mxu1 %v1384_v25 }
  0x51   : > { %1182 = vmatpush3.bf16.msra.mxu0 %v1384_v25  ;;  %1303 = vmatpush3.bf16.msra.mxu1 %v1384_v25  ;;  %v1265_v25 = vpack.c.bf16 (!%p1037_p13), %v659_v24, %v658_v23 }
  0x52   : > { %1183 = vmatprep.subr.bf16.mxu0 %v1385_v26  ;;  %1296 = vmatprep.subr.bf16.mxu1 %v1385_v26 }
  0x55   : > { %1184 = vmatpush3.bf16.msra.mxu0 %v1385_v26  ;;  %1304 = vmatpush3.bf16.msra.mxu1 %v1385_v26 }
  0x56   : > { %1258 = vmatprep.subr.bf16.mxu0 (!%p1037_p13), %v1257_v20  ;;  %1305 = vmatprep.subr.bf16.mxu1 (!%p1037_p13), %v1257_v20 }
  0x58   : > { %1186 = vmatmul.mubr.bf16.vlgmr.msra.gmra.mrb[0].mxu0 %v1388_v27  ;;  %1194 = vmatmul.mubr.bf16.vlgmr.msra.gmra.mrb[0].mxu1 %v1389_v28  ;;  %v660_v28 = vld [vmem:[%s1671_s2 + $0x30] sm:$0xff] (!%p1037_p13) }
  0x59   : > { %1189 = vmatprep.mubr.bf16.mxu0 %v1390_v29  ;;  %1197 = vmatprep.mubr.bf16.mxu1 %v1391_v30  ;;  %v661_v29 = vld [vmem:[%s1671_s2 + $0x38] sm:$0xff] (!%p1037_p13) }
  0x5a   : > { %1260 = vmatpush3.bf16.msra.mxu0 (!%p1037_p13), %v1257_v20  ;;  %1313 = vmatpush3.bf16.msra.mxu1 (!%p1037_p13), %v1257_v20  ;;  %v1269_v30 = vpack.c.bf16 (!%p1037_p13), %v661_v29, %v660_v28 }
  0x5b   : > { %1262 = vmatprep.subr.bf16.mxu0 (!%p1037_p13), %v1261_v22  ;;  %1306 = vmatprep.subr.bf16.mxu1 (!%p1037_p13), %v1261_v22 }
  0x5e   : > { %1264 = vmatpush3.bf16.msra.mxu0 (!%p1037_p13), %v1261_v22  ;;  %1314 = vmatpush3.bf16.msra.mxu1 (!%p1037_p13), %v1261_v22 }
  0x5f   : > { %1266 = vmatprep.subr.bf16.mxu0 (!%p1037_p13), %v1265_v25  ;;  %1307 = vmatprep.subr.bf16.mxu1 (!%p1037_p13), %v1265_v25 }
  0x60   : > { %1190 = vmatmul.mubr.bf16.gmra.mrb[4].mxu0 %v1392_v31  ;;  %1198 = vmatmul.mubr.bf16.gmra.mrb[4].mxu1 %v1393_v32  ;;  %v662_v31 = vld [vmem:[%s1671_s2 + $0x40] sm:$0xff] (!%p1037_p13)  ;;  %v663_v32 = vld [vmem:[%s1671_s2 + $0x48] sm:$0xff] (!%p1037_p13) }
  0x62   : > { %1268 = vmatpush3.bf16.msra.mxu0 (!%p1037_p13), %v1265_v25  ;;  %1315 = vmatpush3.bf16.msra.mxu1 (!%p1037_p13), %v1265_v25 }
  0x63   : > { %1270 = vmatprep.subr.bf16.mxu0 (!%p1037_p13), %v1269_v30  ;;  %1308 = vmatprep.subr.bf16.mxu1 (!%p1037_p13), %v1269_v30 }
  0x66   : > { %1272 = vmatpush3.bf16.msra.mxu0 (!%p1037_p13), %v1269_v30  ;;  %1316 = vmatpush3.bf16.msra.mxu1 (!%p1037_p13), %v1269_v30 }
 0x12b   : > { %v1187_v37 = vpop.f32.mrb[0].mxu0  ;;  %v1195_v38 = vpop.f32.mrb[0].mxu1 }
 0x12c   : > { %v604_v41 = vadd.f32 %v1187_v37, %v363_v33  ;;  %v612_v42 = vadd.f32 %v1195_v38, %v371_v34  ;;  %v539_v43 = vpop.f32.mrb[1].mxu0  ;;  %v571_v44 = vpop.f32.mrb[1].mxu1  ;;  %v1273_v33 = vpack.c.bf16 (!%p1037_p13), %v663_v32, %v662_v31  ;;  %v664_v34 = vld [vmem:[%s1671_s2 + $0x50] sm:$0xff] (!%p1037_p13)  ;;  %v666_v37 = vld [vmem:[%s1671_s2 + $0x60] sm:$0xff] (!%p1037_p13)  ;;  %v667_v38 = vld [vmem:[%s1671_s2 + $0x68] sm:$0xff] (!%p1037_p13) }
 0x12d   : > { %v602_v47 = vadd.f32 %v539_v43, %v361_v35  ;;  %v610_v48 = vadd.f32 %v571_v44, %v369_v36  ;;  %v1188_v49 = vpop.f32.mrb[2].mxu0  ;;  %v1196_v50 = vpop.f32.mrb[2].mxu1  ;;  %v665_v35 = vld [vmem:[%s1671_s2 + $0x58] sm:$0xff] (!%p1037_p13) }
 0x12e   : > { %620 = vst [vmem:[#allocation2 + $0x10] sm:$0xff] %v604_v41  ;;  %628 = vst [vmem:[#allocation2 + $0x50] sm:$0xff] %v612_v42  ;;  %v605_v51 = vadd.f32 %v1188_v49, %v364_v39  ;;  %v613_v52 = vadd.f32 %v1196_v50, %v372_v40  ;;  %v542_v53 = vpop.f32.mrb[3].mxu0  ;;  %v574_v54 = vpop.f32.mrb[3].mxu1  ;;  %1274 = vmatprep.subr.bf16.mxu0 (!%p1037_p13), %v1273_v33  ;;  %1309 = vmatprep.subr.bf16.mxu1 (!%p1037_p13), %v1273_v33  ;;  %v668_v40 = vld [vmem:[%s1671_s2 + $0x70] sm:$0xff] (!%p1037_p13)  ;;  %v669_v41 = vld [vmem:[%s1671_s2 + $0x78] sm:$0xff] (!%p1037_p13) }
 0x12f   : > { %618 = vst [vmem:[#allocation2] sm:$0xff] %v602_v47  ;;  %626 = vst [vmem:[#allocation2 + $0x40] sm:$0xff] %v610_v48  ;;  %v603_v55 = vadd.f32 %v542_v53, %v362_v45  ;;  %v611_v56 = vadd.f32 %v574_v54, %v370_v46  ;;  %v1277_v36 = vpack.c.bf16 (!%p1037_p13), %v665_v35, %v664_v34  ;;  %1276 = vmatpush3.bf16.msra.mxu0 (!%p1037_p13), %v1273_v33 }
 0x130   : > { %621 = vst [vmem:[#allocation2 + $0x18] sm:$0xff] %v605_v51  ;;  %629 = vst [vmem:[#allocation2 + $0x58] sm:$0xff] %v613_v52  ;;  %1317 = vmatpush3.bf16.msra.mxu1 (!%p1037_p13), %v1273_v33  ;;  %v1281_v39 = vpack.c.bf16 (!%p1037_p13), %v667_v38, %v666_v37  ;;  %v1285_v42 = vpack.c.bf16 (!%p1037_p13), %v669_v41, %v668_v40 }
 0x131   : > { %619 = vst [vmem:[#allocation2 + $0x8] sm:$0xff] %v603_v55  ;;  %627 = vst [vmem:[#allocation2 + $0x48] sm:$0xff] %v611_v56  ;;  %1278 = vmatprep.subr.bf16.mxu0 (!%p1037_p13), %v1277_v36  ;;  %1310 = vmatprep.subr.bf16.mxu1 (!%p1037_p13), %v1277_v36 }
 0x133   : > { %v1191_v61 = vpop.f32.mrb[4].mxu0  ;;  %v1199_v62 = vpop.f32.mrb[4].mxu1  ;;  %637 = sbr.rel (%p1037_p13) target bundleno = 551 (0x227), region = 85  ;;  %1280 = vmatpush3.bf16.msra.mxu0 (!%p1037_p13), %v1277_v36 }
 0x134   : > { %v608_v1 = vadd.f32 %v1191_v61, %v367_v57  ;;  %v616_v2 = vadd.f32 %v1199_v62, %v375_v58  ;;  %v555_v3 = vpop.f32.mrb[5].mxu0  ;;  %v587_v4 = vpop.f32.mrb[5].mxu1  ;;  %1318 = vmatpush3.bf16.msra.mxu1 (!%p1037_p13), %v1277_v36  ;;  %1282 = vmatprep.subr.bf16.mxu0 (!%p1037_p13), %v1281_v39  ;;  %v1038_v57 = vld [vmem:[%s1672_s3] ss:$0 sm:$0xff] (!%p1037_p13) }
 0x135   : > { %v606_v7 = vadd.f32 %v555_v3, %v365_v59  ;;  %v614_v8 = vadd.f32 %v587_v4, %v373_v60  ;;  %v1192_v9 = vpop.f32.mrb[6].mxu0  ;;  %v1200_v10 = vpop.f32.mrb[6].mxu1  ;;  %1311 = vmatprep.subr.bf16.mxu1 (!%p1037_p13), %v1281_v39  ;;  %v640_v45 = vld [vmem:[#allocation2 + $0x10] sm:$0xff] (!%p1037_p13) }
 0x136   : > { %624 = vst [vmem:[#allocation2 + $0x30] sm:$0xff] %v608_v1  ;;  %632 = vst [vmem:[#allocation2 + $0x70] sm:$0xff] %v616_v2  ;;  %v609_v11 = vadd.f32 %v1192_v9, %v368_v63  ;;  %v617_v12 = vadd.f32 %v1200_v10, %v376_v0  ;;  %v558_v13 = vpop.f32.mrb[7].mxu0  ;;  %v590_v14 = vpop.f32.mrb[7].mxu1  ;;  %v638_v26 = vld [vmem:[#allocation2] sm:$0xff] (!%p1037_p13)  ;;  %v648_v46 = vld [vmem:[#allocation2 + $0x50] sm:$0xff] (!%p1037_p13) }
 0x137   : > { %622 = vst [vmem:[#allocation2 + $0x20] sm:$0xff] %v606_v7  ;;  %630 = vst [vmem:[#allocation2 + $0x60] sm:$0xff] %v614_v8  ;;  %v607_v15 = vadd.f32 %v558_v13, %v366_v5  ;;  %v615_v16 = vadd.f32 %v590_v14, %v374_v6  ;;  %v646_v27 = vld [vmem:[#allocation2 + $0x40] sm:$0xff] (!%p1037_p13)  ;;  %1233 = vmatprep.mubr.f32.mxu0 (!%p1037_p13), %v638_v26  ;;  %1284 = vmatpush3.bf16.msra.mxu0 (!%p1037_p13), %v1281_v39  ;;  %v641_v47 = vld [vmem:[#allocation2 + $0x18] sm:$0xff] (!%p1037_p13) }
 0x138   : > { %625 = vst [vmem:[#allocation2 + $0x38] sm:$0xff] %v609_v11  ;;  %633 = vst [vmem:[#allocation2 + $0x78] sm:$0xff] %v617_v12  ;;  %1245 = vmatprep.mubr.f32.mxu1 (!%p1037_p13), %v646_v27  ;;  %1319 = vmatpush3.bf16.msra.mxu1 (!%p1037_p13), %v1281_v39  ;;  %v639_v43 = vld [vmem:[#allocation2 + $0x8] sm:$0xff] (!%p1037_p13)  ;;  %v649_v48 = vld [vmem:[#allocation2 + $0x58] sm:$0xff] (!%p1037_p13) }
 0x139   : > { %623 = vst [vmem:[#allocation2 + $0x28] sm:$0xff] %v607_v15  ;;  %631 = vst [vmem:[#allocation2 + $0x68] sm:$0xff] %v615_v16  ;;  %1286 = vmatprep.subr.bf16.mxu0 (!%p1037_p13), %v1285_v42  ;;  %1312 = vmatprep.subr.bf16.mxu1 (!%p1037_p13), %v1285_v42  ;;  %v647_v44 = vld [vmem:[#allocation2 + $0x48] sm:$0xff] (!%p1037_p13) }
 0x13b   : > { %1288 = vmatpush3.bf16.msra.mxu0 %v1285_v42 }
 0x13c   : > { %1320 = vmatpush3.bf16.msra.mxu1 %v1285_v42 }
 0x13d   : > { %v644_v53 = vld [vmem:[#allocation2 + $0x30] sm:$0xff] }
 0x13e   : > { %1234 = vmatmul.mubr.f32.vlgmr.msra.gmra.mrb[0].mxu0 %v639_v43  ;;  %v642_v49 = vld [vmem:[#allocation2 + $0x20] sm:$0xff]  ;;  %v652_v54 = vld [vmem:[#allocation2 + $0x70] sm:$0xff] }
 0x13f   : > { %1246 = vmatmul.mubr.f32.vlgmr.msra.gmra.mrb[0].mxu1 %v647_v44  ;;  %1236 = vmatprep.mubr.f32.mxu0 %v640_v45  ;;  %v650_v50 = vld [vmem:[#allocation2 + $0x60] sm:$0xff]  ;;  %v645_v55 = vld [vmem:[#allocation2 + $0x38] sm:$0xff] }
 0x140   : > { %1248 = vmatprep.mubr.f32.mxu1 %v648_v46  ;;  %v643_v51 = vld [vmem:[#allocation2 + $0x28] sm:$0xff]  ;;  %v653_v56 = vld [vmem:[#allocation2 + $0x78] sm:$0xff] }
 0x141   : > { %v651_v52 = vld [vmem:[#allocation2 + $0x68] sm:$0xff] }
 0x142   : > { %1237 = vmatmul.mubr.f32.gmra.mrb[2].mxu0 %v641_v47 }
 0x143   : > { %1249 = vmatmul.mubr.f32.gmra.mrb[2].mxu1 %v649_v48  ;;  %1239 = vmatprep.mubr.f32.mxu0 %v642_v49 }
 0x144   : > { %1251 = vmatprep.mubr.f32.mxu1 %v650_v50 }
 0x146   : > { %1240 = vmatmul.mubr.f32.gmra.mrb[4].mxu0 %v643_v51 }
 0x147   : > { %1252 = vmatmul.mubr.f32.gmra.mrb[4].mxu1 %v651_v52  ;;  %1242 = vmatprep.mubr.f32.mxu0 %v644_v53 }
 0x148   : > { %1254 = vmatprep.mubr.f32.mxu1 %v652_v54 }
 0x14a   : > { %1243 = vmatmul.mubr.f32.gmra.mrb[6].mxu0 %v645_v55 }
 0x14b   : > { %1255 = vmatmul.mubr.f32.gmra.mrb[6].mxu1 %v653_v56 }
 0x211   : > { %v1235_v58 = vpop.f32.mrb[0].mxu0 }
 0x212   : > { %v1247_v59 = vpop.f32.mrb[0].mxu1  ;;  %v749_v60 = vadd.f32 %v1235_v58, %v1038_v57  ;;  %v743_v62 = vpop.f32.mrb[1].mxu0 }
 0x213   : > { %v789_v61 = vadd.f32 %v1247_v59, %v1038_v57  ;;  %v783_v63 = vpop.f32.mrb[1].mxu1  ;;  %v744_v0 = vadd.f32 %v1038_v57, %v743_v62 }
 0x214   : > { %v784_v1 = vadd.f32 %v1038_v57, %v783_v63  ;;  %v823_v2 = vmax.f32 %v749_v60, 0.0 }
 0x215   : > { %v831_v3 = vmax.f32 %v789_v61, 0.0  ;;  %v822_v4 = vmax.f32 %v744_v0, 0.0  ;;  %v1238_v6 = vpop.f32.mrb[2].mxu0 }
 0x216   : > { %v830_v5 = vmax.f32 %v784_v1, 0.0  ;;  %v1250_v7 = vpop.f32.mrb[2].mxu1  ;;  %v759_v8 = vadd.f32 %v1238_v6, %v1038_v57  ;;  %v753_v10 = vpop.f32.mrb[3].mxu0 }
 0x217   : > { %v799_v9 = vadd.f32 %v1250_v7, %v1038_v57  ;;  %v793_v11 = vpop.f32.mrb[3].mxu1  ;;  %v1077_v12 = vpack.c.bf16 %v823_v2, %v822_v4  ;;  %v754_v14 = vadd.f32 %v1038_v57, %v753_v10 }
 0x218   : > { %v1097_v13 = vpack.c.bf16 %v831_v3, %v830_v5  ;;  %v794_v15 = vadd.f32 %v1038_v57, %v793_v11  ;;  %v825_v16 = vmax.f32 %v759_v8, 0.0 }
 0x219   : > { %v833_v17 = vmax.f32 %v799_v9, 0.0  ;;  %1078 = vst [vmem:[%s1567_s7] sm:$0xff] %v1077_v12   ;;  %v824_v18 = vmax.f32 %v754_v14, 0.0  ;;  %v1241_v20 = vpop.f32.mrb[4].mxu0 }
 0x21a   : > { %1117 = vst [vmem:[%s1567_s7 + $0x20] sm:$0xff] %v1097_v13   ;;  %v832_v19 = vmax.f32 %v794_v15, 0.0  ;;  %v1253_v21 = vpop.f32.mrb[4].mxu1  ;;  %v769_v22 = vadd.f32 %v1241_v20, %v1038_v57  ;;  %v763_v24 = vpop.f32.mrb[5].mxu0 }
 0x21b   : > { %v809_v23 = vadd.f32 %v1253_v21, %v1038_v57  ;;  %v803_v25 = vpop.f32.mrb[5].mxu1  ;;  %v1082_v26 = vpack.c.bf16 %v825_v16, %v824_v18  ;;  %v764_v28 = vadd.f32 %v1038_v57, %v763_v24 }
 0x21c   : > { %v1102_v27 = vpack.c.bf16 %v833_v17, %v832_v19  ;;  %v804_v29 = vadd.f32 %v1038_v57, %v803_v25  ;;  %v827_v30 = vmax.f32 %v769_v22, 0.0 }
 0x21d   : > { %v835_v31 = vmax.f32 %v809_v23, 0.0  ;;  %1114 = vst [vmem:[%s1567_s7 + $0x8] sm:$0xff] %v1082_v26   ;;  %v826_v32 = vmax.f32 %v764_v28, 0.0  ;;  %v1244_v34 = vpop.f32.mrb[6].mxu0 }
 0x21e   : > { %1118 = vst [vmem:[%s1567_s7 + $0x28] sm:$0xff] %v1102_v27   ;;  %v834_v33 = vmax.f32 %v804_v29, 0.0  ;;  %v1256_v35 = vpop.f32.mrb[6].mxu1  ;;  %v779_v36 = vadd.f32 %v1244_v34, %v1038_v57  ;;  %v773_v38 = vpop.f32.mrb[7].mxu0 }
 0x21f   : > { %v819_v37 = vadd.f32 %v1256_v35, %v1038_v57  ;;  %v813_v39 = vpop.f32.mrb[7].mxu1  ;;  %v1087_v40 = vpack.c.bf16 %v827_v30, %v826_v32  ;;  %v774_v42 = vadd.f32 %v1038_v57, %v773_v38 }
 0x220   : > { %v1107_v41 = vpack.c.bf16 %v835_v31, %v834_v33  ;;  %v814_v43 = vadd.f32 %v1038_v57, %v813_v39  ;;  %v829_v44 = vmax.f32 %v779_v36, 0.0 }
 0x221   : > { %v837_v45 = vmax.f32 %v819_v37, 0.0  ;;  %1115 = vst [vmem:[%s1567_s7 + $0x10] sm:$0xff] %v1087_v40   ;;  %v828_v46 = vmax.f32 %v774_v42, 0.0 }
 0x222   : > { %1119 = vst [vmem:[%s1567_s7 + $0x30] sm:$0xff] %v1107_v41   ;;  %v836_v47 = vmax.f32 %v814_v43, 0.0 }
 0x223   : > { %v1092_v48 = vpack.c.bf16 %v829_v44, %v828_v46 }
 0x224   : > { %v1112_v49 = vpack.c.bf16 %v837_v45, %v836_v47 }
 0x225   : > { %1116 = vst [vmem:[%s1567_s7 + $0x18] sm:$0xff] %v1092_v48  }
 0x226   : > { %1120 = vst [vmem:[%s1567_s7 + $0x38] sm:$0xff] %v1112_v49  }
 0x227 PF: > { %s14_s21 = sadd.s32 1, %s1448_s21   ;;  %s1674_s15 = smov %s1428_s16 }
 0x228   : > { %p11_p0 = scmp.ge.s32.totalorder %s14_s21, 6   ;;  %s1675_s16 = smov %s1527_s28 }
 0x229   : > { %s1676_s17 = smov %s1440_s19  ;;  %s1677_s18 = smov %s1444_s20 }
 0x22a   : > { %s1678_s19 = smov %s1681_s22  ;;  %s1679_s20 = smov %s1685_s23 }
 0x22b   :  { %13 = sbr.rel (!%p11_p0) target bundleno = 4 (0x4), region = 123 }

// kernel: gcn_forward_pallas.7
= control target key start
LH: loop header
LB: loop body
LE: loop exit
PB: predicated region body
PF: predicated region fallthrough
CT: control target
= control target key end

     0   :  { %s1256_s30 = smov 0   ;;  %s1514_s0 = inlined_call_operand.vmem [shape: bf16[256,128], index: 0, kind: input, shape index: {}]   ;;  %s1515_s1 = inlined_call_operand.vmem [shape: f32[8,256], index: 1, kind: input, shape index: {}]   ;;  %s1516_s2 = inlined_call_operand.vmem [shape: f32[1,128], index: 2, kind: input, shape index: {}]   ;;  %s1517_s3 = inlined_call_operand.vmem [shape: f32[1,128], index: 3, kind: input, shape index: {}]   ;;  %s1518_s4 = inlined_call_operand.vmem [shape: f32[128,128], index: 4, kind: input, shape index: {}]   ;;  %s1519_s5 = inlined_call_operand.vmem [shape: f32[1,128], index: 5, kind: input, shape index: {}]   ;;  %s1520_s6 = inlined_call_operand.vmem [shape: f32[128,128], index: 6, kind: input, shape index: {}]   ;;  %s1521_s7 = inlined_call_operand.vmem [shape: f32[1,128], index: 7, kind: input, shape index: {}]   ;;  %s1522_s8 = inlined_call_operand.vmem [shape: f32[8,128], index: 8, kind: output, shape index: {0}]   ;;  %s1523_s9 = inlined_call_operand.vmem [shape: f32[8,128], index: 9, kind: output, shape index: {1}]  }
   0x1 LB: > { %s1262_s10 = sadd.s32 4294967295, %s1197_s30   ;;  %p867_p0 = scmp.ge.s32.totalorder %s1197_s30, 1  ;;  %s1197_s30 = sphi %s1256_s30, %s20_s30  }
   0x2   : > { %p290_p1 = scmp.lt.s32.totalorder %s1197_s30, 3 }
   0x4   : > { %p291_p2 = pnand %p867_p0, %p290_p1 }
   0x5   : > { %s868_s11 = sshll.u32 (!%p291_p2), %s1262_s10, 4  ;;  %p331_p3 = scmp.lt.s32.totalorder (!%p291_p2), %s1262_s10, 1 }
   0x6   : > { %294 = sbr.rel (%p291_p2) target bundleno = 1032 (0x408), region = 52  ;;  %p326_p4 = scmp.lt.s32.totalorder (!%p291_p2), %s868_s11, 31 }
   0x7   : > { %p871_p5 = scmp.ne.s32.totalorder (!%p291_p2), %s1262_s10, 0 }
   0xd   : > { %s332_s12 = scalar_select %p331_p3, %s1262_s10, 1 }
   0xe   : > { %s1525_s11 = smov (!%p326_p4, %s868_s11), 31  ;;  %338 = sbr.rel (%p871_p5) target bundleno = 21 (0x15), region = 56 }
   0xf   : > { %s870_s13 = sshll.u32 %s332_s12, 3  ;;  %s869_s14 = sshll.u32 %s1525_s11, 2  ;;  %v1199_v0 = vmov (!%p871_p5), 0.0  }
  0x10   : > { %s1272_s17 = scalar_lea.vmem %s1515_s1, %s870_s13  ;;  %s1277_s20 = scalar_lea.vmem %s1514_s0, %s869_s14  ;;  %339 = vst [vmem:[#allocation2] sm:$0x1] (!%p871_p5), %v1199_v0  ;;  %340 = vst [vmem:[#allocation3] sm:$0x1] (!%p871_p5), %v1199_v0 }
  0x11   : > { %341 = vst [vmem:[#allocation4] sm:$0xff] (!%p871_p5), %v1199_v0 }
  0x15 PF: > { %s872_s21 = sshll.u32 %s1262_s10, 7  ;;  %v375_v1 = vlaneseq  ;;  %v1200_v2 = vmov 0.0|0.0   ;;  %v896_v3 = vld [vmem:[%s1277_s20] sm:$0xff]   ;;  %v927_v5 = vld [vmem:[%s1277_s20 + $0x8] sm:$0xff]   ;;  %v1290_v10 = vld [vmem:[%s1277_s20 + $0x10] sm:$0xff]   ;;  %p889_p6 = scmp.ne.s32.totalorder %s1262_s10, 1 }
  0x16   : > { %1090 = vmatprep.subr.bf16.mxu0 %v1200_v2  ;;  %v1283_v4 = vstv %s872_s21  ;;  %v897_v6 = vunpack.c.l.bf16 %v896_v3  ;;  %v898_v7 = vunpack.c.h.bf16 %v896_v3  ;;  %v901_v9 = vunpack.c.l.bf16 %v927_v5  ;;  %v1293_v11 = vld [vmem:[%s1277_s20 + $0x18] sm:$0xff]   ;;  %v1319_v45 = vld [vmem:[%s1277_s20 + $0x20] sm:$0xff]   ;;  %v1332_v60 = vld [vmem:[%s1277_s20 + $0x28] sm:$0xff]  }
  0x17   : > { %v1287_v8 = vshrl.u32 %v375_v1, 7  ;;  %v902_v12 = vunpack.c.h.bf16 %v927_v5  ;;  %v905_v13 = vunpack.c.l.bf16 %v1290_v10  ;;  %v906_v14 = vunpack.c.h.bf16 %v1290_v10 }
  0x18   : > { %v909_v15 = vunpack.c.l.bf16 %v1293_v11  ;;  %v910_v35 = vunpack.c.h.bf16 %v1293_v11  ;;  %v913_v47 = vunpack.c.l.bf16 %v1319_v45  ;;  %v914_v48 = vunpack.c.h.bf16 %v1319_v45 }
  0x19   : > { %v377_v16 = vadd.s32 8, %v1287_v8  ;;  %v393_v17 = vadd.s32 %v1283_v4, %v1287_v8  ;;  %v378_v18 = vadd.s32 16, %v1287_v8  ;;  %v379_v19 = vadd.s32 24, %v1287_v8 }
  0x1a   : > { %v380_v20 = vadd.s32 32, %v1287_v8  ;;  %v381_v21 = vadd.s32 40, %v1287_v8  ;;  %v382_v22 = vadd.s32 48, %v1287_v8  ;;  %v383_v23 = vadd.s32 56, %v1287_v8 }
  0x1b   : > { %v394_v24 = vadd.s32 %v1283_v4, %v377_v16  ;;  %vm409_vm0 = vcmp.lt.s32.totalorder %v393_v17, 256  ;;  %v395_v25 = vadd.s32 %v1283_v4, %v378_v18  ;;  %v396_v26 = vadd.s32 %v1283_v4, %v379_v19 }
  0x1c   : > { %v425_v27 = vsel %vm409_vm0, %v897_v6, 0.0  ;;  %v397_v28 = vadd.s32 %v1283_v4, %v380_v20  ;;  %v398_v29 = vadd.s32 %v1283_v4, %v381_v21  ;;  %v399_v30 = vadd.s32 %v1283_v4, %v382_v22 }
  0x1d   : > { %vm410_vm1 = vcmp.lt.s32.totalorder %v394_v24, 256  ;;  %v466_v31 = vmul.f32 %v425_v27, %v425_v27  ;;  %vm411_vm2 = vcmp.lt.s32.totalorder %v395_v25, 256  ;;  %vm412_vm3 = vcmp.lt.s32.totalorder %v396_v26, 256 }
  0x1e   : > { %v426_v32 = vsel %vm410_vm1, %v898_v7, 0.0  ;;  %vm1092_vm4 = vmpackc.low %vm410_vm1, %vm409_vm0  ;;  %v427_v33 = vsel %vm411_vm2, %v901_v9, 0.0  ;;  %v428_v34 = vsel %vm412_vm3, %v902_v12, 0.0  ;;  %vm413_vm5 = vcmp.lt.s32.totalorder %v397_v28, 256 }
  0x1f   : > { %v442_v36 = vadd.f32 %v426_v32, %v425_v27  ;;  %v467_v37 = vmul.f32 %v426_v32, %v426_v32  ;;  %1093 = vmatpush3.bf16.msk.msra.mxu0 %vm1092_vm4, %v896_v3  ;;  %v468_v38 = vmul.f32 %v427_v33, %v427_v33  ;;  %v469_v39 = vmul.f32 %v428_v34, %v428_v34  ;;  %vm1096_vm6 = vmpackc.low %vm412_vm3, %vm411_vm2 }
  0x20   : > { %1094 = vmatprep.subr.bf16.mxu0 %v1200_v2  ;;  %vm414_vm7 = vcmp.lt.s32.totalorder %v398_v29, 256  ;;  %v429_v40 = vsel %vm413_vm5, %v905_v13, 0.0  ;;  %v400_v41 = vadd.s32 %v1283_v4, %v383_v23  ;;  %vm415_vm8 = vcmp.lt.s32.totalorder %v399_v30, 256 }
  0x21   : > { %v482_v42 = vadd.f32 %v467_v37, %v466_v31  ;;  %v443_v43 = vadd.f32 %v442_v36, %v427_v33  ;;  %v430_v44 = vsel %vm414_vm7, %v906_v14, 0.0  ;;  %v431_v46 = vsel %vm415_vm8, %v909_v15, 0.0  ;;  %vm1100_vm10 = vmpackc.low %vm414_vm7, %vm413_vm5 }
  0x22   : > { %v384_v49 = vadd.s32 64, %v1287_v8  ;;  %v470_v52 = vmul.f32 %v429_v40, %v429_v40  ;;  %vm416_vm9 = vcmp.lt.s32.totalorder %v400_v41, 256  ;;  %v471_v53 = vmul.f32 %v430_v44, %v430_v44 }
  0x23   : > { %v444_v50 = vadd.f32 %v443_v43, %v428_v34  ;;  %v483_v51 = vadd.f32 %v482_v42, %v468_v38  ;;  %1097 = vmatpush3.bf16.msk.msra.mxu0 %vm1096_vm6, %v927_v5  ;;  %v432_v54 = vsel %vm416_vm9, %v910_v35, 0.0  ;;  %v385_v55 = vadd.s32 72, %v1287_v8  ;;  %vm1104_vm12 = vmpackc.low %vm416_vm9, %vm415_vm8  ;;  %v933_v35 = vld [vmem:[%s1277_s20 + $0x38] sm:$0xff]  }
  0x24   : > { %1098 = vmatprep.subr.bf16.mxu0 %v1200_v2  ;;  %v401_v56 = vadd.s32 %v1283_v4, %v384_v49  ;;  %v472_v59 = vmul.f32 %v431_v46, %v431_v46  ;;  %v386_v61 = vadd.s32 80, %v1287_v8  ;;  %v917_v63 = vunpack.c.l.bf16 %v1332_v60 }
  0x25   : > { %v484_v57 = vadd.f32 %v483_v51, %v469_v39  ;;  %v445_v58 = vadd.f32 %v444_v50, %v429_v40  ;;  %v402_v62 = vadd.s32 %v1283_v4, %v385_v55  ;;  %v387_v0 = vadd.s32 88, %v1287_v8 }
  0x26   : > { %vm417_vm11 = vcmp.lt.s32.totalorder %v401_v56, 256  ;;  %v403_v7 = vadd.s32 %v1283_v4, %v386_v61  ;;  %v473_v9 = vmul.f32 %v432_v54, %v432_v54  ;;  %v918_v16 = vunpack.c.h.bf16 %v1332_v60  ;;  %v506_v61 = vld [vmem:[%s1272_s17] sm:$0xff] }
  0x27   : > { %v446_v3 = vadd.f32 %v445_v58, %v430_v44  ;;  %v485_v5 = vadd.f32 %v484_v57, %v470_v52  ;;  %1101 = vmatpush3.bf16.msk.msra.mxu0 %vm1100_vm10, %v1290_v10  ;;  %v433_v6 = vsel %vm417_vm11, %v913_v47, 0.0  ;;  %vm418_vm13 = vcmp.lt.s32.totalorder %v402_v62, 256  ;;  %v932_v10 = vld [vmem:[%s1277_s20 + $0x30] sm:$0xff]  }
  0x28   : > { %1102 = vmatprep.subr.bf16.mxu0 %v1200_v2  ;;  %v404_v12 = vadd.s32 %v1283_v4, %v387_v0  ;;  %v434_v15 = vsel %vm418_vm13, %v914_v48, 0.0  ;;  %v474_v17 = vmul.f32 %v433_v6, %v433_v6  ;;  %vm419_vm14 = vcmp.lt.s32.totalorder %v403_v7, 256  ;;  %vm1108_vm15 = vmpackc.low %vm418_vm13, %vm417_vm11 }
  0x29   : > { %v486_v13 = vadd.f32 %v485_v5, %v471_v53  ;;  %v447_v14 = vadd.f32 %v446_v3, %v431_v46  ;;  %v921_v18 = vunpack.c.l.bf16 %v932_v10  ;;  %v388_v19 = vadd.s32 96, %v1287_v8 }
  0x2a   : > { %v435_v22 = vsel %vm419_vm14, %v917_v63, 0.0  ;;  %v922_v23 = vunpack.c.h.bf16 %v932_v10  ;;  %v475_v24 = vmul.f32 %v434_v15, %v434_v15  ;;  %vm420_vm0 = vcmp.lt.s32.totalorder %v404_v12, 256 }
  0x2b   : > { %v448_v20 = vadd.f32 %v447_v14, %v432_v54  ;;  %v487_v21 = vadd.f32 %v486_v13, %v472_v59  ;;  %1105 = vmatpush3.bf16.msk.msra.mxu0 %vm1104_vm12, %v1293_v11  ;;  %v389_v25 = vadd.s32 104, %v1287_v8  ;;  %v405_v26 = vadd.s32 %v1283_v4, %v388_v19  ;;  %vm1112_vm3 = vmpackc.low %vm420_vm0, %vm419_vm14  ;;  %v505_v19 = vld [vmem:[#allocation4] sm:$0xff] }
  0x2c   : > { %1106 = vmatprep.subr.bf16.mxu0 %v1200_v2  ;;  %v436_v29 = vsel %vm420_vm0, %v918_v16, 0.0  ;;  %v390_v11 = vadd.s32 112, %v1287_v8  ;;  %v476_v30 = vmul.f32 %v435_v22, %v435_v22  ;;  %v391_v32 = vadd.s32 120, %v1287_v8  ;;  %v465_v16 = vld [vmem:[#allocation3] sm:$0x1] }
  0x2d   : > { %v488_v27 = vadd.f32 %v487_v21, %v473_v9  ;;  %v449_v28 = vadd.f32 %v448_v20, %v433_v6  ;;  %v406_v31 = vadd.s32 %v1283_v4, %v389_v25  ;;  %vm421_vm1 = vcmp.lt.s32.totalorder %v405_v26, 256  ;;  %v619_v25 = vld [vmem:[%s1518_s4 + $0x10] sm:$0xff] (!%p889_p6) }
  0x2e   : > { %v407_v36 = vadd.s32 %v1283_v4, %v390_v11  ;;  %vm1201_vm2 = vmmov 0   ;;  %v1202_v37 = vmov 0.0   ;;  %v477_v38 = vmul.f32 %v436_v29, %v436_v29 }
  0x2f   : > { %v450_v33 = vadd.f32 %v449_v28, %v434_v15  ;;  %v489_v34 = vadd.f32 %v488_v27, %v474_v17  ;;  %1109 = vmatpush3.bf16.msk.msra.mxu0 %vm1108_vm15, %v1319_v45  ;;  %1017 = vmatprep.mubr.msk.f32.mxu0 %vm1201_vm2, %v1202_v37  ;;  %v437_v39 = vsel %vm421_vm1, %v921_v18, 0.0  ;;  %v925_v40 = vunpack.c.l.bf16 %v933_v35  ;;  %v620_v28 = vld [vmem:[%s1518_s4 + $0x18] sm:$0xff] (!%p889_p6) }
  0x30   : > { %1110 = vmatprep.subr.bf16.mxu0 %v1200_v2  ;;  %vm422_vm4 = vcmp.lt.s32.totalorder %v406_v31, 256  ;;  %v408_v43 = vadd.s32 %v1283_v4, %v391_v32  ;;  %v926_v45 = vunpack.c.h.bf16 %v933_v35  ;;  %v478_v48 = vmul.f32 %v437_v39, %v437_v39  ;;  %v622_v31 = vld [vmem:[%s1518_s4 + $0x28] sm:$0xff] (!%p889_p6) }
  0x31   : > { %v490_v41 = vadd.f32 %v489_v34, %v475_v24  ;;  %v451_v42 = vadd.f32 %v450_v33, %v435_v22  ;;  %v438_v44 = vsel %vm422_vm4, %v922_v23, 0.0  ;;  %vm423_vm5 = vcmp.lt.s32.totalorder %v407_v36, 256  ;;  %vm1116_vm6 = vmpackc.low %vm422_vm4, %vm421_vm1  ;;  %v617_v23 = vld [vmem:[%s1518_s4] sm:$0xff] (!%p889_p6)  ;;  %v618_v24 = vld [vmem:[%s1518_s4 + $0x8] sm:$0xff] (!%p889_p6) }
  0x32   : > { %v439_v49 = vsel %vm423_vm5, %v925_v40, 0.0  ;;  %v479_v52 = vmul.f32 %v438_v44, %v438_v44  ;;  %vm424_vm7 = vcmp.lt.s32.totalorder %v408_v43, 256  ;;  %v1203_v26 = vmov (!%p889_p6), 0.0|0.0   ;;  %v710_v36 = vld [vmem:[%s1520_s6] sm:$0xff] (!%p889_p6)  ;;  %v623_v40 = vld [vmem:[%s1518_s4 + $0x30] sm:$0xff] (!%p889_p6) }
  0x33   : > { %v452_v46 = vadd.f32 %v451_v42, %v436_v29  ;;  %v491_v47 = vadd.f32 %v490_v41, %v476_v30  ;;  %1113 = vmatpush3.bf16.msk.msra.mxu0 %vm1112_vm3, %v1332_v60  ;;  %v440_v53 = vsel %vm424_vm7, %v926_v45, 0.0  ;;  %v480_v55 = vmul.f32 %v439_v49, %v439_v49  ;;  %vm1120_vm8 = vmpackc.low %vm424_vm7, %vm423_vm5  ;;  %1146 = vmatprep.subr.bf16.mxu1 (!%p889_p6), %v1203_v26  ;;  %v621_v30 = vld [vmem:[%s1518_s4 + $0x20] sm:$0xff] (!%p889_p6)  ;;  %v624_v41 = vld [vmem:[%s1518_s4 + $0x38] sm:$0xff] (!%p889_p6) }
  0x34   : > { %1114 = vmatprep.subr.bf16.mxu0 %v1200_v2  ;;  %v481_v58 = vmul.f32 %v440_v53, %v440_v53  ;;  %v1123_v27 = vpack.c.bf16 (!%p889_p6), %v618_v24, %v617_v23  ;;  %vm1204_vm9 = vmmov (!%p889_p6), 0   ;;  %v1205_v29 = vmov (!%p889_p6), 0.0  }
  0x35   : > { %v492_v50 = vadd.f32 %v491_v47, %v477_v38  ;;  %v453_v51 = vadd.f32 %v452_v46, %v437_v39  ;;  %1087 = vmatprep.mubr.msk.f32.mxu1 (!%p889_p6), %vm1204_vm9, %v1205_v29  ;;  %v1126_v11 = vpack.c.bf16 (!%p889_p6), %v620_v28, %v619_v25  ;;  %v1129_v37 = vpack.c.bf16 (!%p889_p6), %v622_v31, %v621_v30  ;;  %v711_v38 = vld [vmem:[%s1520_s6 + $0x8] sm:$0xff] (!%p889_p6)  ;;  %v712_v39 = vld [vmem:[%s1520_s6 + $0x10] sm:$0xff] (!%p889_p6)  ;;  %v725_v28 = vld [vmem:[%s1520_s6 + $0x78] sm:$0xff] (!%p889_p6) }
  0x36   : > { %v1147_v43 = vpack.c.bf16 (!%p889_p6), %v711_v38, %v710_v36  ;;  %v1132_v47 = vpack.c.bf16 (!%p889_p6), %v624_v41, %v623_v40 }
  0x37   : > { %v454_v4 = vadd.f32 %v453_v51, %v438_v44  ;;  %v493_v54 = vadd.f32 %v492_v50, %v478_v48  ;;  %1117 = vmatpush3.bf16.msk.msra.mxu0 %vm1116_vm6, %v932_v10  ;;  %v713_v44 = vld [vmem:[%s1520_s6 + $0x18] sm:$0xff] (!%p889_p6)  ;;  %v714_v48 = vld [vmem:[%s1520_s6 + $0x20] sm:$0xff] (!%p889_p6)  ;;  %v626_v51 = vld [vmem:[%s1518_s4 + $0x48] sm:$0xff] (!%p889_p6) }
  0x38   : > { %1118 = vmatprep.subr.bf16.mxu0 %v1200_v2  ;;  %v441_v2 = vld [vmem:[#allocation2] sm:$0x1]  ;;  %1148 = vmatpush3.bf16.msra.mxu1 (!%p889_p6), %v1147_v43  ;;  %v1150_v46 = vpack.c.bf16 (!%p889_p6), %v713_v44, %v712_v39 }
  0x39   : > { %v494_v56 = vadd.f32 %v493_v54, %v479_v52  ;;  %v455_v57 = vadd.f32 %v454_v4, %v439_v49  ;;  %1149 = vmatprep.subr.bf16.mxu1 (!%p889_p6), %v1203_v26  ;;  %v715_v49 = vld [vmem:[%s1520_s6 + $0x28] sm:$0xff] (!%p889_p6)  ;;  %v625_v50 = vld [vmem:[%s1518_s4 + $0x40] sm:$0xff] (!%p889_p6)  ;;  %v716_v54 = vld [vmem:[%s1520_s6 + $0x30] sm:$0xff] (!%p889_p6) }
  0x3a   : > { %v1135_v4 = vpack.c.bf16 (!%p889_p6), %v626_v51, %v625_v50 }
  0x3b   : > { %v456_v59 = vadd.f32 %v455_v57, %v440_v53  ;;  %v495_v60 = vadd.f32 %v494_v56, %v480_v55  ;;  %1121 = vmatpush3.bf16.msk.msra.mxu0 %vm1120_vm8, %v933_v35  ;;  %v1153_v53 = vpack.c.bf16 (!%p889_p6), %v715_v49, %v714_v48  ;;  %v717_v55 = vld [vmem:[%s1520_s6 + $0x38] sm:$0xff] (!%p889_p6)  ;;  %v627_v56 = vld [vmem:[%s1518_s4 + $0x50] sm:$0xff] (!%p889_p6) }
  0x3c   : > { %1122 = vmatprep.subr.bf16.mxu0 (!%p889_p6), %v1203_v26  ;;  %1151 = vmatpush3.bf16.msra.mxu1 (!%p889_p6), %v1150_v46  ;;  %v628_v57 = vld [vmem:[%s1518_s4 + $0x58] sm:$0xff] (!%p889_p6) }
  0x3d   : > { %v457_v62 = vrot.slane %v456_v59, 4  ;;  %v496_v63 = vadd.f32 %v495_v60, %v481_v58  ;;  %1152 = vmatprep.subr.bf16.mxu1 (!%p889_p6), %v1203_v26  ;;  %v1156_v58 = vpack.c.bf16 (!%p889_p6), %v717_v55, %v716_v54  ;;  %v718_v60 = vld [vmem:[%s1520_s6 + $0x40] sm:$0xff] (!%p889_p6) }
  0x3e   : > { %1018 = vmatmul.mubr.f32.vlgmr.msra.gmra.mrb[0].mxu0 %v506_v61  ;;  %v719_v61 = vld [vmem:[%s1520_s6 + $0x48] sm:$0xff] (!%p889_p6) }
  0x3f   : > { %v458_v0 = vadd.f32 %v457_v62, %v456_v59  ;;  %v497_v3 = vrot.slane %v496_v63, 4  ;;  %1052 = vmatprep.mubr.msk.f32.mxu0 (!%p889_p6), %vm1204_vm9, %v1205_v29  ;;  %1124 = vmatpush3.bf16.msra.mxu0 (!%p889_p6), %v1123_v27  ;;  %v1138_v59 = vpack.c.bf16 (!%p889_p6), %v628_v57, %v627_v56  ;;  %v629_v62 = vld [vmem:[%s1518_s4 + $0x60] sm:$0xff] (!%p889_p6)  ;;  %v724_v27 = vld [vmem:[%s1520_s6 + $0x70] sm:$0xff] (!%p889_p6) }
  0x40   : > { %1125 = vmatprep.subr.bf16.mxu0 (!%p889_p6), %v1203_v26  ;;  %1154 = vmatpush3.bf16.msra.mxu1 (!%p889_p6), %v1153_v53  ;;  %v1168_v29 = vpack.c.bf16 (!%p889_p6), %v725_v28, %v724_v27 }
  0x41   : > { %v459_v5 = vrot.slane %v458_v0, 2  ;;  %v498_v6 = vadd.f32 %v497_v3, %v496_v63  ;;  %1155 = vmatprep.subr.bf16.mxu1 (!%p889_p6), %v1203_v26  ;;  %v630_v63 = vld [vmem:[%s1518_s4 + $0x68] sm:$0xff] (!%p889_p6)  ;;  %v1159_v3 = vpack.c.bf16 (!%p889_p6), %v719_v61, %v718_v60 }
  0x43   : > { %v460_v7 = vadd.f32 %v459_v5, %v458_v0  ;;  %v499_v9 = vrot.slane %v498_v6, 2  ;;  %1127 = vmatpush3.bf16.msra.mxu0 (!%p889_p6), %v1126_v11  ;;  %v589_v0 = vld [vmem:[%s1516_s2] sm:$0x1] (!%p889_p6)  ;;  %v1141_v5 = vpack.c.bf16 (!%p889_p6), %v630_v63, %v629_v62 }
  0x44   : > { %1128 = vmatprep.subr.bf16.mxu0 (!%p889_p6), %v1203_v26  ;;  %1157 = vmatpush3.bf16.msra.mxu1 (!%p889_p6), %v1156_v58  ;;  %v891_v11 = vld [vmem:[%s1519_s5] ss:$0 sm:$0xff] (!%p889_p6) }
  0x45   : > { %v461_v12 = vrot.slane %v460_v7, 1  ;;  %v500_v13 = vadd.f32 %v499_v9, %v498_v6  ;;  %v597_v6 = vsub.s32 (!%p889_p6), 0, %v1287_v8  ;;  %1158 = vmatprep.subr.bf16.mxu1 (!%p889_p6), %v1203_v26  ;;  %v721_v9 = vld [vmem:[%s1520_s6 + $0x58] sm:$0xff] (!%p889_p6) }
  0x46   : > { %v632_v8 = vld [vmem:[%s1518_s4 + $0x78] sm:$0xff] (!%p889_p6) }
  0x47   : > { %v462_v14 = vadd.f32 %v461_v12, %v460_v7  ;;  %v501_v15 = vrot.slane %v500_v13, 1  ;;  %1130 = vmatpush3.bf16.msra.mxu0 (!%p889_p6), %v1129_v37  ;;  %v720_v7 = vld [vmem:[%s1520_s6 + $0x50] sm:$0xff] (!%p889_p6) }
  0x48   : > { %1131 = vmatprep.subr.bf16.mxu0 (!%p889_p6), %v1203_v26  ;;  %1160 = vmatpush3.bf16.msra.mxu1 (!%p889_p6), %v1159_v3 }
  0x49   : > { %v463_v10 = vadd.f32 %v462_v14, %v441_v2  ;;  %v502_v17 = vadd.f32 %v501_v15, %v500_v13  ;;  %v631_v13 = vld [vmem:[%s1518_s4 + $0x70] sm:$0xff] (!%p889_p6)  ;;  %v1162_v15 = vpack.c.bf16 (!%p889_p6), %v721_v9, %v720_v7  ;;  %1161 = vmatprep.subr.bf16.mxu1 (!%p889_p6), %v1203_v26 }
  0x4b   : > { %464 = vst [vmem:[#allocation2] sm:$0x1] %v463_v10  ;;  %v503_v18 = vadd.f32 %v502_v17, %v465_v16  ;;  %1133 = vmatpush3.bf16.msra.mxu0 (!%p889_p6), %v1132_v47  ;;  %v1144_v16 = vpack.c.bf16 (!%p889_p6), %v632_v8, %v631_v13 }
  0x4c   : > { %1134 = vmatprep.subr.bf16.mxu0 (!%p889_p6), %v1203_v26  ;;  %1163 = vmatpush3.bf16.msra.mxu1 (!%p889_p6), %v1162_v15 }
  0x4d   : > { %504 = vst [vmem:[#allocation3] sm:$0x1] %v503_v18  ;;  %v722_v18 = vld [vmem:[%s1520_s6 + $0x60] sm:$0xff] (!%p889_p6)  ;;  %1164 = vmatprep.subr.bf16.mxu1 (!%p889_p6), %v1203_v26 }
  0x4f   : > { %1136 = vmatpush3.bf16.msra.mxu0 (!%p889_p6), %v1135_v4 }
  0x50   : > { %1137 = vmatprep.subr.bf16.mxu0 (!%p889_p6), %v1203_v26 }
  0x52   : > { %v583_v32 = vld [vmem:[#allocation2] sm:$0x1] (!%p889_p6) }
  0x53   : > { %v1395_v34 = vmul.f32 (!%p889_p6), 0.00390625, %v583_v32  ;;  %1139 = vmatpush3.bf16.msra.mxu0 (!%p889_p6), %v1138_v59 }
  0x54   : > { %v585_v33 = vld [vmem:[#allocation3] sm:$0x1] (!%p889_p6)  ;;  %1140 = vmatprep.subr.bf16.mxu0 (!%p889_p6), %v1203_v26 }
  0x55   : > { %v586_v35 = vmul.f32 (!%p889_p6), 0.00390625, %v585_v33  ;;  %v587_v42 = vmul.f32 (!%p889_p6), %v1395_v34, %v1395_v34  ;;  %v892_v33 = vld [vmem:[%s1521_s7] ss:$0 sm:$0xff] (!%p889_p6) }
  0x57   : > { %v588_v45 = vsub.f32 (!%p889_p6), %v586_v35, %v587_v42  ;;  %1142 = vmatpush3.bf16.msra.mxu0 (!%p889_p6), %v1141_v5 }
  0x58   : > { %1143 = vmatprep.subr.bf16.mxu0 (!%p889_p6), %v1203_v26 }
  0x59   : > { %v590_v52 = vadd.f32 (!%p889_p6), 1e-05, %v588_v45 }
  0x5b   : > { %1185 = vrsqrt.f32 (!%p889_p6), %v590_v52  ;;  %1145 = vmatpush3.bf16.msra.mxu0 (!%p889_p6), %v1144_v16 }
  0x65   : > { %v1186_v12 = vpop.eup (!%p889_p6), %1185 }
  0x66   : > { %v592_v2 = vmul.f32 (!%p889_p6), %v1186_v12, %v589_v0 }
  0x68   : > { %v598_v10 = vrot.slane (!%p889_p6), %v592_v2, %v597_v6  ;;  %v601_v17 = vmul.f32 (!%p889_p6), %v592_v2, %v1395_v34 }
 0x10e   : > { %582 = sbr.rel (%p889_p6) target bundleno = 1032 (0x408), region = 60 }
 0x111   : > { %v573_v20 = vpop.f32.mrb[0].mxu0 }
 0x112   : > { %v577_v21 = vadd.f32 %v573_v20, %v505_v19  ;;  %v1019_v22 = vpop.f32.mrb[1].mxu0  ;;  %v723_v19 = vld [vmem:[%s1520_s6 + $0x68] sm:$0xff] (!%p889_p6) }
 0x113   : > { %v890_v22 = vld [vmem:[%s1517_s3] ss:$0 sm:$0xff] (!%p889_p6)  ;;  %v1165_v23 = vpack.c.bf16 (!%p889_p6), %v723_v19, %v722_v18 }
 0x114   : > { %578 = vst [vmem:[#allocation4] sm:$0xff] %v577_v21  ;;  %v606_v21 = vrot.slane (!%p889_p6), %v601_v17, %v597_v6 }
 0x115   : > { %1166 = vmatpush3.bf16.msra.mxu1 %v1165_v23 }
 0x116   : > { %1167 = vmatprep.subr.bf16.mxu1 %v1203_v26  ;;  %v805_v26 = vand.u32 127, %v375_v1 }
 0x118   : > { %vm806_vm10 = vcmp.lt.s32.totalorder %v805_v26, 4 }
 0x119   : > { %1169 = vmatpush3.bf16.msra.mxu1 %v1168_v29 }
 0x11b   : > { %v593_v14 = vld [vmem:[#allocation4] sm:$0xff] }
 0x11c   : > { %v600_v20 = vmul.f32 %v598_v10, %v593_v14 }
 0x11e   : > { %v608_v24 = vsub.f32 %v600_v20, %v606_v21 }
 0x120   : > { %v616_v25 = vadd.f32 %v890_v22, %v608_v24 }
 0x122   : > { %1053 = vmatmul.mubr.f32.vlgmr.msra.gmra.mrb[0].mxu0 %v616_v25 }
 0x1f5   : > { %v706_v30 = vpop.f32.mrb[0].mxu0 }
 0x1f6   : > { %v707_v31 = vadd.f32 %v891_v11, %v706_v30  ;;  %v1054_v32 = vpop.f32.mrb[1].mxu0 }
 0x1f8   : > { %1088 = vmatmul.mubr.f32.vlgmr.msra.gmra.mrb[0].mxu1 %v707_v31 }
 0x2cb   : > { %v799_v34 = vpop.f32.mrb[0].mxu1 }
 0x2cc   : > { %v800_v35 = vadd.f32 %v892_v33, %v799_v34  ;;  %v1089_v36 = vpop.f32.mrb[1].mxu1 }
 0x2ce   : > { %803 = vst [vmem:[%s1522_s8] sm:$0xff] %v800_v35  ;;  %v807_v37 = vsel %vm806_vm10, %v800_v35, -1e+30 }
 0x2cf   : > { %808 = vmax.xlane.f32.xlu0 %v807_v37 }
 0x35c   : > { %v809_v38 = vpop.xlane.xlu0 %808 }
 0x35d   : > { %v810_v39 = vsub.f32 %v807_v37, %v809_v38 }
 0x35f   : > { %v811_v40 = vmul.f32 1.442695, %v810_v39 }
 0x361   : > { %1187 = vpow2.f32 %v811_v40 }
 0x36b   : > { %v1188_v41 = vpop.eup %1187 }
 0x36c   : > { %813 = vadd.xlane.f32.xlu0 %v1188_v41 }
 0x3f9   : > { %v814_v1 = vpop.xlane.xlu0 %813 }
 0x3fa   : > { %1189 = vrcp.f32 %v814_v1 }
 0x404   : > { %v1190_v42 = vpop.eup %1189 }
 0x405   : > { %v816_v43 = vmul.f32 %v1190_v42, %v1188_v41 }
 0x407   : > { %817 = vst [vmem:[%s1523_s9] sm:$0xff] %v816_v43 }
 0x408 PF: > { %s20_s30 = sadd.s32 1, %s1197_s30  }
 0x409   : > { %p17_p7 = scmp.ge.s32.totalorder %s20_s30, 4  }
 0x40b   :  { %19 = sbr.rel (!%p17_p7) target bundleno = 1 (0x1), region = 97 }

</bundles_post_ra>
